<compile_context>
chip_gen: v6e
topology: v6e:2x2x1
jax: 0.10.0
libtpu: 0.0.40
codegen_flags: <defaults>
</compile_context>

<pallas_src>
import functools

import jax
import jax.numpy as jnp
from jax.experimental import pallas as pl
from jax.experimental.pallas import tpu as pltpu

_BN_EPS = 1e-5
_LEAKY_SLOPE = 0.01  # F.leaky_relu default negative_slope
_LANE = 128
_SUBLANE = 8


def _round_up(x, m):
    return (x + m - 1) // m * m


def _pick_tiles(n):
    """(n_pad, tile_m, tile_k) for the tiled aggregation path."""
    if n <= 2048:
        tile_k = _round_up(max(n, 256), 256)   # collapse k grid for small graphs
    else:
        tile_k = 1024                          # large contraction tiles: fewer steps
    n_pad = _round_up(n, tile_k)
    # Row tile: aim for >= 4 row tiles (>= 2 per TensorCore on v7x megacore).
    tile_m = 512
    while tile_m > 64 and (n_pad % tile_m != 0 or n_pad // tile_m < 4):
        tile_m //= 2
    return n_pad, tile_m, tile_k


def _fused_vmem_bytes(n_pad, din, d_pad, out_bytes):
    a = n_pad * n_pad * 2
    scl = n_pad * _LANE * 4
    h = n_pad * din * 2
    w = din * 2 * d_pad * 2
    z = n_pad * 2 * d_pad * 4
    acc = n_pad * d_pad * 4
    out = n_pad * d_pad * out_bytes
    return int(1.5 * (a + scl + h + w + z + acc + out))


# --------------------------------------------------------------------------
# Small-graph path: fully fused layer (projection + aggregation) in one call
# --------------------------------------------------------------------------
def _fused_layer_kernel(a_ref, scale_ref, h_ref, w_ref, bias_ref, o_ref,
                        *, d_pad, apply_act):
    z = jnp.dot(h_ref[...], w_ref[...], preferred_element_type=jnp.float32)
    z_nb = z[:, :d_pad].astype(jnp.bfloat16)
    z_lin = z[:, d_pad:] + bias_ref[...]
    acc = jnp.dot(a_ref[...], z_nb, preferred_element_type=jnp.float32)
    out = scale_ref[...] * acc + z_lin
    if apply_act:
        out = jnp.where(out > 0, out, _LEAKY_SLOPE * out)
    o_ref[...] = out.astype(o_ref.dtype)


def _fused_layer(a_bin, scale, h, w_cat, bias, d_pad, out_dtype, apply_act):
    n_pad = a_bin.shape[0]
    din = h.shape[1]
    kernel = functools.partial(_fused_layer_kernel, d_pad=d_pad, apply_act=apply_act)
    return pl.pallas_call(
        kernel,
        out_shape=jax.ShapeDtypeStruct((n_pad, d_pad), out_dtype),
        grid_spec=pltpu.PrefetchScalarGridSpec(
            num_scalar_prefetch=0,
            grid=(1,),
            in_specs=[
                pl.BlockSpec((n_pad, n_pad), lambda i: (0, 0)),   # binary A + I (bf16)
                pl.BlockSpec((n_pad, 1), lambda i: (0, 0)),       # 1/(deg+1) row scale
                pl.BlockSpec((n_pad, din), lambda i: (0, 0)),     # H (bf16)
                pl.BlockSpec((din, 2 * d_pad), lambda i: (0, 0)), # [W_neigh | W_lin]
                pl.BlockSpec((1, d_pad), lambda i: (0, 0)),       # fused bias
            ],
            out_specs=pl.BlockSpec((n_pad, d_pad), lambda i: (0, 0)),
        ),
        compiler_params=pltpu.CompilerParams(dimension_semantics=("arbitrary",)),
    )(a_bin, scale, h, w_cat, bias)


# --------------------------------------------------------------------------
# Tiled path, kernel 1: fused projection  Z = H @ [W_neigh | W_lin]
#   -> Z_neigh half emitted in bf16, Z_lin half emitted f32 with bias folded in.
# --------------------------------------------------------------------------
def _proj_kernel(h_ref, w_ref, bias_ref, znb_ref, zlin_ref, *, d_pad):
    z = jnp.dot(h_ref[...], w_ref[...], preferred_element_type=jnp.float32)
    znb_ref[...] = z[:, :d_pad].astype(jnp.bfloat16)
    zlin_ref[...] = z[:, d_pad:] + bias_ref[...]


def _proj(h, w_cat, bias, d_pad, tile_m):
    n_pad, din = h.shape
    kernel = functools.partial(_proj_kernel, d_pad=d_pad)
    return pl.pallas_call(
        kernel,
        out_shape=(jax.ShapeDtypeStruct((n_pad, d_pad), jnp.bfloat16),
                   jax.ShapeDtypeStruct((n_pad, d_pad), jnp.float32)),
        grid_spec=pltpu.PrefetchScalarGridSpec(
            num_scalar_prefetch=0,
            grid=(n_pad // tile_m,),
            in_specs=[pl.BlockSpec((tile_m, din), lambda i: (i, 0)),
                      pl.BlockSpec((din, 2 * d_pad), lambda i: (0, 0)),
                      pl.BlockSpec((1, d_pad), lambda i: (0, 0))],
            out_specs=[pl.BlockSpec((tile_m, d_pad), lambda i: (i, 0)),
                       pl.BlockSpec((tile_m, d_pad), lambda i: (i, 0))],
        ),
        compiler_params=pltpu.CompilerParams(dimension_semantics=("parallel",)),
    )(h, w_cat, bias)


# --------------------------------------------------------------------------
# Tiled path, kernel 2: aggregation
#   out = scale * ((A+I) @ Z_neigh) + Z_lin   [+ LeakyReLU]
#   Z_neigh is VMEM-resident (bf16); only A is streamed per step.
# --------------------------------------------------------------------------
def _agg_kernel(a_ref, znb_ref, zlin_ref, scale_ref, o_ref, acc_ref,
                *, tile_k, apply_act):
    k = pl.program_id(1)

    @pl.when(k == 0)
    def _():
        acc_ref[...] = jnp.zeros_like(acc_ref)

    start = pl.multiple_of(k * tile_k, tile_k)
    acc_ref[...] += jnp.dot(a_ref[...], znb_ref[pl.ds(start, tile_k), :],
                            preferred_element_type=jnp.float32)

    @pl.when(k == pl.num_programs(1) - 1)
    def _():
        out = scale_ref[...] * acc_ref[...] + zlin_ref[...]
        if apply_act:
            out = jnp.where(out > 0, out, _LEAKY_SLOPE * out)
        o_ref[...] = out.astype(o_ref.dtype)


def _aggregate(a_bin, z_nb, z_lin, scale, d_pad, tile_m, tile_k, out_dtype, apply_act):
    n_pad = a_bin.shape[0]
    out_bytes = 2 if out_dtype == jnp.bfloat16 else 4
    est = (2 * tile_m * tile_k * 2            # A tiles (double-buffered, bf16)
           + 2 * n_pad * d_pad * 2            # resident Z_neigh (bf16)
           + 2 * tile_m * d_pad * 4           # Z_lin tiles (f32)
           + 2 * tile_m * _LANE * 4           # row-scale tiles (lane padded)
           + 2 * tile_m * d_pad * out_bytes   # output tiles
           + tile_m * d_pad * 4)              # f32 accumulator scratch
    # v5e scoped default is only 16 MiB; raise explicitly once the resident Z_neigh
    # or large contraction tiles would exceed it.
    vmem_limit = int(est * 1.25) + (4 << 20) if est > (12 << 20) else None
    kernel = functools.partial(_agg_kernel, tile_k=tile_k, apply_act=apply_act)
    return pl.pallas_call(
        kernel,
        out_shape=jax.ShapeDtypeStruct((n_pad, d_pad), out_dtype),
        grid_spec=pltpu.PrefetchScalarGridSpec(
            num_scalar_prefetch=0,
            grid=(n_pad // tile_m, n_pad // tile_k),
            in_specs=[
                pl.BlockSpec((tile_m, tile_k), lambda i, k: (i, k)),  # A tile (streamed)
                pl.BlockSpec((n_pad, d_pad), lambda i, k: (0, 0)),    # Z_neigh (resident)
                pl.BlockSpec((tile_m, d_pad), lambda i, k: (i, 0)),   # Z_lin (+bias)
                pl.BlockSpec((tile_m, 1), lambda i, k: (i, 0)),       # 1/(deg+1)
            ],
            out_specs=pl.BlockSpec((tile_m, d_pad), lambda i, k: (i, 0)),
            scratch_shapes=[pltpu.VMEM((tile_m, d_pad), jnp.float32)],
        ),
        compiler_params=pltpu.CompilerParams(
            dimension_semantics=("parallel", "arbitrary"),
            vmem_limit_bytes=vmem_limit),
    )(a_bin, z_nb, z_lin, scale)


# --------------------------------------------------------------------------
# Model wrapper
# --------------------------------------------------------------------------
def sage_forward(a_bin, scale, x, w, *, hid_pad, out_pad, out_size,
                 force_tiled=False):
    n = a_bin.shape[0]
    n_pad, tile_m, tile_k = _pick_tiles(n)
    pad_n = n_pad - n

    a = jnp.pad(a_bin, ((0, pad_n), (0, pad_n))).astype(jnp.bfloat16)   # exact 0/1
    s = jnp.pad(scale, ((0, pad_n), (0, 0)), constant_values=1.0).astype(jnp.float32)
    h = jnp.pad(x, ((0, pad_n), (0, 0))).astype(jnp.bfloat16)

    use_fused = (not force_tiled) and (
        max(_fused_vmem_bytes(n_pad, x.shape[1], hid_pad, 2),
            _fused_vmem_bytes(n_pad, hid_pad, out_pad, 4)) <= (6 << 20))

    # input_drop (p=0.25) / dropout (p=0.75): identity in eval mode.
    if use_fused:
        h = _fused_layer(a, s, h, w["w_cat0"], w["b0"], hid_pad, jnp.bfloat16, True)
        h = _fused_layer(a, s, h, w["w_cat1"], w["b1"], out_pad, jnp.float32, False)
    else:
        z_nb, z_lin = _proj(h, w["w_cat0"], w["b0"], hid_pad, tile_m)
        h = _aggregate(a, z_nb, z_lin, s, hid_pad, tile_m, tile_k, jnp.bfloat16, True)
        z_nb, z_lin = _proj(h, w["w_cat1"], w["b1"], out_pad, tile_m)
        h = _aggregate(a, z_nb, z_lin, s, out_pad, tile_m, tile_k, jnp.float32, False)
    return h[:n, :out_size]


# --------------------------------------------------------------------------
# Parameter prep: fold eval-mode BN into layer-0, fuse [W_neigh | W_lin],
# pad feature dims to 128 lanes, bf16 weights.
# --------------------------------------------------------------------------
def prepare_params(p, in_size, hid_size, out_size):
    hid_pad = _round_up(hid_size, _LANE)
    out_pad = _round_up(out_size, _LANE)

    def pad_cols(a, d):
        return jnp.pad(a, ((0, 0), (0, d - a.shape[1])))

    def pad_rows(a, d):
        return jnp.pad(a, ((0, d - a.shape[0]), (0, 0)))

    # Fold eval-mode BatchNorm1d: BN(y) = y*s + t, s = gamma*rsqrt(var+eps),
    # t = beta - mean*s.  Column scaling commutes with the A_hat left-matmul.
    s = p["gamma"] * jax.lax.rsqrt(p["rvar"] + _BN_EPS)
    t = p["beta"] - p["rmean"] * s
    wn0 = p["wn0"] * s
    wl0 = p["wl0"] * s
    b0 = (p["bn0"] + p["bl0"]) * s + t

    w_cat0 = jnp.concatenate([pad_cols(wn0, hid_pad), pad_cols(wl0, hid_pad)], axis=1)
    w_cat1 = jnp.concatenate(
        [pad_cols(pad_rows(p["wn1"], hid_pad), out_pad),
         pad_cols(pad_rows(p["wl1"], hid_pad), out_pad)], axis=1)

    weights = {
        "w_cat0": w_cat0.astype(jnp.bfloat16),
        "b0": pad_cols(b0, hid_pad).astype(jnp.float32),
        "w_cat1": w_cat1.astype(jnp.bfloat16),
        "b1": pad_cols(p["bn1"] + p["bl1"], out_pad).astype(jnp.float32),
    }
    return weights, hid_pad, out_pad


# --------------------------------------------------------------------------
# References
# --------------------------------------------------------------------------
def sage_reference_tight(a_bin, scale, x, w, hid_pad, out_pad, out_size):
    """Mirrors the kernel math (bf16 MXU operands, folded BN, binary A + f32 scale)."""
    hp = jax.lax.Precision.HIGHEST
    f32 = jnp.float32

    def b2f(v):
        return v.astype(jnp.bfloat16).astype(f32)

    a16 = b2f(a_bin)            # exact (binary values)
    h = b2f(x)

    def layer(h, w_cat, bias, d_pad, act, out_bf16):
        z = jnp.dot(h, w_cat.astype(f32), precision=hp)
        z_nb = b2f(z[:, :d_pad])
        z_lin = z[:, d_pad:] + bias
        out = scale * jnp.dot(a16, z_nb, precision=hp) + z_lin
        if act:
            out = jnp.where(out > 0, out, _LEAKY_SLOPE * out)
        return b2f(out) if out_bf16 else out

    h = layer(h, w["w_cat0"], w["b0"], hid_pad, True, True)
    h = layer(h, w["w_cat1"], w["b1"], out_pad, False, False)
    return h[:, :out_size]


def sage_reference_f32(a_bin, scale, x, p):
    """Original (unfused, unpadded, f32) module math — loose semantic check."""
    hp = jax.lax.Precision.HIGHEST
    a_hat = a_bin * scale
    h = x
    conv = jnp.dot(jnp.dot(a_hat, h, precision=hp), p["wn0"], precision=hp) + p["bn0"]
    lin = jnp.dot(h, p["wl0"], precision=hp) + p["bl0"]
    h = conv + lin
    h = (h - p["rmean"]) / jnp.sqrt(p["rvar"] + _BN_EPS) * p["gamma"] + p["beta"]
    h = jnp.where(h > 0, h, _LEAKY_SLOPE * h)
    conv = jnp.dot(jnp.dot(a_hat, h, precision=hp), p["wn1"], precision=hp) + p["bn1"]
    lin = jnp.dot(h, p["wl1"], precision=hp) + p["bl1"]
    return conv + lin


# --------------------------------------------------------------------------
# Setup helpers
# --------------------------------------------------------------------------
def init_params(key, in_size, hid_size, out_size):
    ks = jax.random.split(key, 8)
    f32 = jnp.float32
    return {
        # SAGEConv fc_neigh weights (stored transposed: (Din, Dout)) + biases
        "wn0": jax.random.normal(ks[0], (in_size, hid_size), f32) * 0.1,
        "bn0": jax.random.normal(ks[1], (1, hid_size), f32) * 0.1,
        "wn1": jax.random.normal(ks[2], (hid_size, out_size), f32) * 0.1,
        "bn1": jax.random.normal(ks[3], (1, out_size), f32) * 0.1,
        # nn.Linear skip weights (transposed) + biases
        "wl0": jax.random.normal(ks[4], (in_size, hid_size), f32) * 0.1,
        "bl0": jax.random.normal(ks[5], (1, hid_size), f32) * 0.1,
        "wl1": jax.random.normal(ks[6], (hid_size, out_size), f32) * 0.1,
        "bl1": jax.random.normal(ks[7], (1, out_size), f32) * 0.1,
        # BatchNorm1d(hid_size) default affine params / running stats (eval mode)
        "gamma": jnp.ones((1, hid_size), f32),
        "beta": jnp.zeros((1, hid_size), f32),
        "rmean": jnp.zeros((1, hid_size), f32),
        "rvar": jnp.ones((1, hid_size), f32),
    }


def build_graph(key, n):
    """Random graph -> (binary A + I, 1/(in_degree+1) row scale) for 'gcn' aggregation."""
    adj = (jax.random.uniform(key, (n, n)) < 0.3).astype(jnp.float32)
    adj = adj * (1.0 - jnp.eye(n, dtype=jnp.float32))   # no explicit self loops
    deg = jnp.sum(adj, axis=1, keepdims=True)           # in-degree of row node i
    a_bin = adj + jnp.eye(n, dtype=jnp.float32)
    scale = 1.0 / (deg + 1.0)
    return a_bin, scale


if __name__ == "__main__":
    # TODO(synk): a sparse CSR / padded-neighbor-list path with scalar-prefetched
    #             indices would replace the dense O(N^2) adjacency at real scale.
    N, IN_SIZE, HID_SIZE, OUT_SIZE = 256, 64, 32, 16

    key = jax.random.PRNGKey(0)
    k_graph, k_feat, k_param = jax.random.split(key, 3)

    a_bin, scale = build_graph(k_graph, N)
    features = jax.random.normal(k_feat, (N, IN_SIZE), jnp.float32)
    params = init_params(k_param, IN_SIZE, HID_SIZE, OUT_SIZE)
    weights, hid_pad, out_pad = prepare_params(params, IN_SIZE, HID_SIZE, OUT_SIZE)

    fwd_fused = jax.jit(functools.partial(
        sage_forward, hid_pad=hid_pad, out_pad=out_pad, out_size=OUT_SIZE))
    fwd_tiled = jax.jit(functools.partial(
        sage_forward, hid_pad=hid_pad, out_pad=out_pad, out_size=OUT_SIZE,
        force_tiled=True))

    out = jax.block_until_ready(fwd_fused(a_bin, scale, features, weights))
    out_t = jax.block_until_ready(fwd_tiled(a_bin, scale, features, weights))
    assert out.shape == (N, OUT_SIZE)
    assert out_t.shape == (N, OUT_SIZE)

    # Tight check vs a reference that mirrors the kernel math (bf16 MXU operands).
    ref_tight = sage_reference_tight(a_bin, scale, features, weights,
                                     hid_pad, out_pad, OUT_SIZE)
    assert jnp.allclose(out, ref_tight, rtol=2e-3, atol=2e-3), \
        "Fused-path output mismatch vs bf16-mirroring reference"
    assert jnp.allclose(out_t, ref_tight, rtol=2e-3, atol=2e-3), \
        "Tiled-path output mismatch vs bf16-mirroring reference"

    # Loose check vs the original full-f32 unfused/unpadded module math.
    ref_f32 = sage_reference_f32(a_bin, scale, features, params)
    assert jnp.allclose(out, ref_f32, rtol=5e-2, atol=5e-2), \
        "Fused-path output mismatch vs f32 module reference"
    assert jnp.allclose(out_t, ref_f32, rtol=5e-2, atol=5e-2), \
        "Tiled-path output mismatch vs f32 module reference"

    print("KERNEL_OK")
</pallas_src>

<mosaic_0001>
module attributes {stable_mosaic.version = 11 : i64} {
  func.func @_fused_layer_kernel(%arg0: i32, %arg1: memref<256x256xbf16, #tpu.memory_space<vmem>>, %arg2: memref<256x1xf32, #tpu.memory_space<vmem>>, %arg3: memref<256x64xbf16, #tpu.memory_space<vmem>>, %arg4: memref<64x256xbf16, #tpu.memory_space<vmem>>, %arg5: memref<1x128xf32, #tpu.memory_space<vmem>>, %arg6: memref<256x128xbf16, #tpu.memory_space<vmem>>) attributes {dimension_semantics = [#tpu.dimension_semantics<arbitrary>], iteration_bounds = array<i64: 1>, scalar_prefetch = 0 : i64, scratch_operands = 0 : i64, tpu.core_type = #tpu.core_type<tc>, window_params = [{pipeline_mode = #tpu.pipeline_mode<synchronous>, transform_indices = @transform_0, window_bounds = array<i64: 256, 256>}, {pipeline_mode = #tpu.pipeline_mode<synchronous>, transform_indices = @transform_1, window_bounds = array<i64: 256, 1>}, {pipeline_mode = #tpu.pipeline_mode<synchronous>, transform_indices = @transform_2, window_bounds = array<i64: 256, 64>}, {pipeline_mode = #tpu.pipeline_mode<synchronous>, transform_indices = @transform_3, window_bounds = array<i64: 64, 256>}, {pipeline_mode = #tpu.pipeline_mode<synchronous>, transform_indices = @transform_4, window_bounds = array<i64: 1, 128>}, {pipeline_mode = #tpu.pipeline_mode<synchronous>, transform_indices = @transform_5, window_bounds = array<i64: 256, 128>}]} {
    %c0 = arith.constant 0 : index
    %c0_0 = arith.constant 0 : index
    %0 = vector.load %arg3[%c0, %c0_0] : memref<256x64xbf16, #tpu.memory_space<vmem>>, vector<256x64xbf16>
    %c0_1 = arith.constant 0 : index
    %c0_2 = arith.constant 0 : index
    %1 = vector.load %arg4[%c0_1, %c0_2] : memref<64x256xbf16, #tpu.memory_space<vmem>>, vector<64x256xbf16>
    %cst = arith.constant dense<0.000000e+00> : vector<256x256xf32>
    %2 = tpu.matmul %0, %1, %cst {dimension_numbers = #tpu.dot_dimension_numbers<[1], [0], [0], [1], [0, 0, 1, 1], [], []>} : vector<256x64xbf16>, vector<64x256xbf16>, vector<256x256xf32> -> vector<256x256xf32>
    %3 = vector.extract_strided_slice %2 {offsets = [0, 0], sizes = [256, 128], strides = [1, 1]} : vector<256x256xf32> to vector<256x128xf32>
    %4 = arith.truncf %3 : vector<256x128xf32> to vector<256x128xbf16>
    %5 = vector.extract_strided_slice %2 {offsets = [0, 128], sizes = [256, 128], strides = [1, 1]} : vector<256x256xf32> to vector<256x128xf32>
    %c0_3 = arith.constant 0 : index
    %c0_4 = arith.constant 0 : index
    %6 = vector.load %arg5[%c0_3, %c0_4] : memref<1x128xf32, #tpu.memory_space<vmem>>, vector<1x128xf32>
    %7 = vector.broadcast %6 : vector<1x128xf32> to vector<256x128xf32>
    %8 = arith.addf %5, %7 : vector<256x128xf32>
    %c0_5 = arith.constant 0 : index
    %c0_6 = arith.constant 0 : index
    %9 = vector.load %arg1[%c0_5, %c0_6] : memref<256x256xbf16, #tpu.memory_space<vmem>>, vector<256x256xbf16>
    %cst_7 = arith.constant dense<0.000000e+00> : vector<256x128xf32>
    %10 = tpu.matmul %9, %4, %cst_7 {dimension_numbers = #tpu.dot_dimension_numbers<[1], [0], [0], [1], [0, 0, 1, 1], [], []>} : vector<256x256xbf16>, vector<256x128xbf16>, vector<256x128xf32> -> vector<256x128xf32>
    %c0_8 = arith.constant 0 : index
    %c0_9 = arith.constant 0 : index
    %11 = vector.load %arg2[%c0_8, %c0_9] : memref<256x1xf32, #tpu.memory_space<vmem>>, vector<256x1xf32>
    %12 = vector.broadcast %11 : vector<256x1xf32> to vector<256x128xf32>
    %13 = arith.mulf %12, %10 : vector<256x128xf32>
    %14 = arith.addf %13, %8 : vector<256x128xf32>
    %cst_10 = arith.constant 0.000000e+00 : f32
    %15 = vector.broadcast %cst_10 : f32 to vector<256x128xf32>
    %16 = arith.cmpf ogt, %14, %15 : vector<256x128xf32>
    %cst_11 = arith.constant 0.00999999977 : f32
    %17 = vector.broadcast %cst_11 : f32 to vector<256x128xf32>
    %18 = arith.mulf %17, %14 : vector<256x128xf32>
    %19 = arith.select %16, %14, %18 : vector<256x128xi1>, vector<256x128xf32>
    %20 = arith.truncf %19 : vector<256x128xf32> to vector<256x128xbf16>
    %c0_12 = arith.constant 0 : index
    %c0_13 = arith.constant 0 : index
    %21 = vector.load %arg6[%c0_12, %c0_13] : memref<256x128xbf16, #tpu.memory_space<vmem>>, vector<256x128xbf16>
    tpu.vector_store %arg6[%c0_12, %c0_13], %20 {strides = array<i32>} : memref<256x128xbf16, #tpu.memory_space<vmem>>, vector<256x128xbf16>,
    return
  }
  func.func @transform_0(%arg0: i32) -> (i32, i32) {
    %c0_i32 = arith.constant 0 : i32
    %c0_i32_0 = arith.constant 0 : i32
    %c0_i32_1 = arith.constant 0 : i32
    return %c0_i32, %c0_i32_0 : i32, i32
  }
  func.func @transform_1(%arg0: i32) -> (i32, i32) {
    %c0_i32 = arith.constant 0 : i32
    %c0_i32_0 = arith.constant 0 : i32
    %c0_i32_1 = arith.constant 0 : i32
    return %c0_i32, %c0_i32_0 : i32, i32
  }
  func.func @transform_2(%arg0: i32) -> (i32, i32) {
    %c0_i32 = arith.constant 0 : i32
    %c0_i32_0 = arith.constant 0 : i32
    %c0_i32_1 = arith.constant 0 : i32
    return %c0_i32, %c0_i32_0 : i32, i32
  }
  func.func @transform_3(%arg0: i32) -> (i32, i32) {
    %c0_i32 = arith.constant 0 : i32
    %c0_i32_0 = arith.constant 0 : i32
    %c0_i32_1 = arith.constant 0 : i32
    return %c0_i32, %c0_i32_0 : i32, i32
  }
  func.func @transform_4(%arg0: i32) -> (i32, i32) {
    %c0_i32 = arith.constant 0 : i32
    %c0_i32_0 = arith.constant 0 : i32
    %c0_i32_1 = arith.constant 0 : i32
    return %c0_i32, %c0_i32_0 : i32, i32
  }
  func.func @transform_5(%arg0: i32) -> (i32, i32) {
    %c0_i32 = arith.constant 0 : i32
    %c0_i32_0 = arith.constant 0 : i32
    %c0_i32_1 = arith.constant 0 : i32
    return %c0_i32, %c0_i32_0 : i32, i32
  }
}

module attributes {stable_mosaic.version = 11 : i64} {
  func.func @_fused_layer_kernel(%arg0: i32, %arg1: memref<256x256xbf16, #tpu.memory_space<vmem>>, %arg2: memref<256x1xf32, #tpu.memory_space<vmem>>, %arg3: memref<256x128xbf16, #tpu.memory_space<vmem>>, %arg4: memref<128x256xbf16, #tpu.memory_space<vmem>>, %arg5: memref<1x128xf32, #tpu.memory_space<vmem>>, %arg6: memref<256x128xf32, #tpu.memory_space<vmem>>) attributes {dimension_semantics = [#tpu.dimension_semantics<arbitrary>], iteration_bounds = array<i64: 1>, scalar_prefetch = 0 : i64, scratch_operands = 0 : i64, tpu.core_type = #tpu.core_type<tc>, window_params = [{pipeline_mode = #tpu.pipeline_mode<synchronous>, transform_indices = @transform_0, window_bounds = array<i64: 256, 256>}, {pipeline_mode = #tpu.pipeline_mode<synchronous>, transform_indices = @transform_1, window_bounds = array<i64: 256, 1>}, {pipeline_mode = #tpu.pipeline_mode<synchronous>, transform_indices = @transform_2, window_bounds = array<i64: 256, 128>}, {pipeline_mode = #tpu.pipeline_mode<synchronous>, transform_indices = @transform_3, window_bounds = array<i64: 128, 256>}, {pipeline_mode = #tpu.pipeline_mode<synchronous>, transform_indices = @transform_4, window_bounds = array<i64: 1, 128>}, {pipeline_mode = #tpu.pipeline_mode<synchronous>, transform_indices = @transform_5, window_bounds = array<i64: 256, 128>}]} {
    %c0 = arith.constant 0 : index
    %c0_0 = arith.constant 0 : index
    %0 = vector.load %arg3[%c0, %c0_0] : memref<256x128xbf16, #tpu.memory_space<vmem>>, vector<256x128xbf16>
    %c0_1 = arith.constant 0 : index
    %c0_2 = arith.constant 0 : index
    %1 = vector.load %arg4[%c0_1, %c0_2] : memref<128x256xbf16, #tpu.memory_space<vmem>>, vector<128x256xbf16>
    %cst = arith.constant dense<0.000000e+00> : vector<256x256xf32>
    %2 = tpu.matmul %0, %1, %cst {dimension_numbers = #tpu.dot_dimension_numbers<[1], [0], [0], [1], [0, 0, 1, 1], [], []>} : vector<256x128xbf16>, vector<128x256xbf16>, vector<256x256xf32> -> vector<256x256xf32>
    %3 = vector.extract_strided_slice %2 {offsets = [0, 0], sizes = [256, 128], strides = [1, 1]} : vector<256x256xf32> to vector<256x128xf32>
    %4 = arith.truncf %3 : vector<256x128xf32> to vector<256x128xbf16>
    %5 = vector.extract_strided_slice %2 {offsets = [0, 128], sizes = [256, 128], strides = [1, 1]} : vector<256x256xf32> to vector<256x128xf32>
    %c0_3 = arith.constant 0 : index
    %c0_4 = arith.constant 0 : index
    %6 = vector.load %arg5[%c0_3, %c0_4] : memref<1x128xf32, #tpu.memory_space<vmem>>, vector<1x128xf32>
    %7 = vector.broadcast %6 : vector<1x128xf32> to vector<256x128xf32>
    %8 = arith.addf %5, %7 : vector<256x128xf32>
    %c0_5 = arith.constant 0 : index
    %c0_6 = arith.constant 0 : index
    %9 = vector.load %arg1[%c0_5, %c0_6] : memref<256x256xbf16, #tpu.memory_space<vmem>>, vector<256x256xbf16>
    %cst_7 = arith.constant dense<0.000000e+00> : vector<256x128xf32>
    %10 = tpu.matmul %9, %4, %cst_7 {dimension_numbers = #tpu.dot_dimension_numbers<[1], [0], [0], [1], [0, 0, 1, 1], [], []>} : vector<256x256xbf16>, vector<256x128xbf16>, vector<256x128xf32> -> vector<256x128xf32>
    %c0_8 = arith.constant 0 : index
    %c0_9 = arith.constant 0 : index
    %11 = vector.load %arg2[%c0_8, %c0_9] : memref<256x1xf32, #tpu.memory_space<vmem>>, vector<256x1xf32>
    %12 = vector.broadcast %11 : vector<256x1xf32> to vector<256x128xf32>
    %13 = arith.mulf %12, %10 : vector<256x128xf32>
    %14 = arith.addf %13, %8 : vector<256x128xf32>
    %c0_10 = arith.constant 0 : index
    %c0_11 = arith.constant 0 : index
    %15 = vector.load %arg6[%c0_10, %c0_11] : memref<256x128xf32, #tpu.memory_space<vmem>>, vector<256x128xf32>
    tpu.vector_store %arg6[%c0_10, %c0_11], %14 {strides = array<i32>} : memref<256x128xf32, #tpu.memory_space<vmem>>, vector<256x128xf32>,
    return
  }
  func.func @transform_0(%arg0: i32) -> (i32, i32) {
    %c0_i32 = arith.constant 0 : i32
    %c0_i32_0 = arith.constant 0 : i32
    %c0_i32_1 = arith.constant 0 : i32
    return %c0_i32, %c0_i32_0 : i32, i32
  }
  func.func @transform_1(%arg0: i32) -> (i32, i32) {
    %c0_i32 = arith.constant 0 : i32
    %c0_i32_0 = arith.constant 0 : i32
    %c0_i32_1 = arith.constant 0 : i32
    return %c0_i32, %c0_i32_0 : i32, i32
  }
  func.func @transform_2(%arg0: i32) -> (i32, i32) {
    %c0_i32 = arith.constant 0 : i32
    %c0_i32_0 = arith.constant 0 : i32
    %c0_i32_1 = arith.constant 0 : i32
    return %c0_i32, %c0_i32_0 : i32, i32
  }
  func.func @transform_3(%arg0: i32) -> (i32, i32) {
    %c0_i32 = arith.constant 0 : i32
    %c0_i32_0 = arith.constant 0 : i32
    %c0_i32_1 = arith.constant 0 : i32
    return %c0_i32, %c0_i32_0 : i32, i32
  }
  func.func @transform_4(%arg0: i32) -> (i32, i32) {
    %c0_i32 = arith.constant 0 : i32
    %c0_i32_0 = arith.constant 0 : i32
    %c0_i32_1 = arith.constant 0 : i32
    return %c0_i32, %c0_i32_0 : i32, i32
  }
  func.func @transform_5(%arg0: i32) -> (i32, i32) {
    %c0_i32 = arith.constant 0 : i32
    %c0_i32_0 = arith.constant 0 : i32
    %c0_i32_1 = arith.constant 0 : i32
    return %c0_i32, %c0_i32_0 : i32, i32
  }
}

</mosaic_0001>

<bundles_post_ra>
// kernel: sage_forward.3
= control target key start
LH: loop header
LB: loop body
LE: loop exit
PB: predicated region body
PF: predicated region fallthrough
CT: control target
= control target key end

     0   :  { %v1406_v1 = vmov 0   ;;  %s2065_s3 = inlined_call_operand.vmem [shape: bf16[128,256], index: 3, kind: input, shape index: {}]   ;;  %s2066_s2 = inlined_call_operand.vmem [shape: bf16[256,128], index: 2, kind: input, shape index: {}]   ;;  %s2067_s0 = inlined_call_operand.vmem [shape: bf16[256,256], index: 0, kind: input, shape index: {}]   ;;  %s2068_s1 = inlined_call_operand.vmem [shape: f32[256,1], index: 1, kind: input, shape index: {}]   ;;  %s2069_s4 = inlined_call_operand.vmem [shape: f32[1,128], index: 4, kind: input, shape index: {}]   ;;  %s2070_s5 = inlined_call_operand.vmem [shape: f32[256,128], index: 5, kind: output, shape index: {}]  }
   0x1   :  { %v1318_v0 = vld [vmem:[%s2065_s3 + $0x74] ss:$8 sps:$4 sm:$0xff]   ;;  %277 = vmatprep.mubr.bf16.mxu0 %v1406_v1  ;;  %1316 = vset.pattern.permute.xlu0 %v1406_v1  ;;  %v1320_v2 = vld [vmem:[%s2065_s3 + $0x70] ss:$8 sps:$4 sm:$0xff]   ;;  %v1321_v3 = vld [vmem:[%s2065_s3 + $0x64] ss:$8 sps:$4 sm:$0xff]  }
   0x2   :  { %1317 = vset.pattern.permute.xlu1 %v1406_v1  ;;  %245 = vmatprep.subr.bf16.mxu0 %v1318_v0  ;;  %v1323_v4 = vld [vmem:[%s2065_s3 + $0x60] ss:$8 sps:$4 sm:$0xff]   ;;  %v1324_v5 = vld [vmem:[%s2065_s3 + $0x54] ss:$8 sps:$4 sm:$0xff]   ;;  %v1326_v6 = vld [vmem:[%s2065_s3 + $0x50] ss:$8 sps:$4 sm:$0xff]  }
   0x3   :  { %246 = vmatpush1.bf16.msra.mxu0 %v1320_v2  ;;  %v1327_v7 = vld [vmem:[%s2065_s3 + $0x44] ss:$8 sps:$4 sm:$0xff]   ;;  %v1329_v8 = vld [vmem:[%s2065_s3 + $0x40] ss:$8 sps:$4 sm:$0xff]   ;;  %v1330_v9 = vld [vmem:[%s2065_s3 + $0x34] ss:$8 sps:$4 sm:$0xff]  }
   0x4   :  { %247 = vmatprep.subr.bf16.mxu0 %v1321_v3  ;;  %v1332_v10 = vld [vmem:[%s2065_s3 + $0x30] ss:$8 sps:$4 sm:$0xff]   ;;  %v1333_v11 = vld [vmem:[%s2065_s3 + $0x24] ss:$8 sps:$4 sm:$0xff]   ;;  %v1335_v12 = vld [vmem:[%s2065_s3 + $0x20] ss:$8 sps:$4 sm:$0xff]  }
   0x5   :  { %v1336_v13 = vld [vmem:[%s2065_s3 + $0x14] ss:$8 sps:$4 sm:$0xff]   ;;  %v1338_v14 = vld [vmem:[%s2065_s3 + $0x10] ss:$8 sps:$4 sm:$0xff]   ;;  %v1339_v15 = vld [vmem:[%s2065_s3 + $0x4] ss:$8 sps:$4 sm:$0xff]  }
   0x6   :  { %v1341_v16 = vld [vmem:[%s2065_s3] ss:$8 sps:$4 sm:$0xff]   ;;  %v1344_v19 = vld [vmem:[%s2066_s2 + $0x10] sm:$0xff]   ;;  %v1345_v20 = vld [vmem:[%s2066_s2 + $0x18] sm:$0xff]  }
   0x7   :  { %248 = vmatpush1.bf16.msra.mxu0 %v1323_v4  ;;  %v1342_v17 = vld [vmem:[%s2066_s2] sm:$0xff]   ;;  %v1343_v18 = vld [vmem:[%s2066_s2 + $0x8] sm:$0xff]   ;;  %v1348_v23 = vld [vmem:[%s2066_s2 + $0x30] sm:$0xff]  }
   0x8   :  { %249 = vmatprep.subr.bf16.mxu0 %v1324_v5  ;;  %v1346_v21 = vld [vmem:[%s2066_s2 + $0x20] sm:$0xff]   ;;  %v1347_v22 = vld [vmem:[%s2066_s2 + $0x28] sm:$0xff]   ;;  %v1349_v24 = vld [vmem:[%s2066_s2 + $0x38] sm:$0xff]  }
   0x9   :  { %v1350_v25 = vld [vmem:[%s2066_s2 + $0x40] sm:$0xff]   ;;  %v1351_v26 = vld [vmem:[%s2066_s2 + $0x48] sm:$0xff]   ;;  %v1352_v27 = vld [vmem:[%s2066_s2 + $0x50] sm:$0xff]  }
   0xa   :  { %v1353_v28 = vld [vmem:[%s2066_s2 + $0x58] sm:$0xff]   ;;  %v1354_v29 = vld [vmem:[%s2066_s2 + $0x60] sm:$0xff]   ;;  %v1355_v30 = vld [vmem:[%s2066_s2 + $0x68] sm:$0xff]  }
   0xb   :  { %250 = vmatpush1.bf16.msra.mxu0 %v1326_v6  ;;  %v1356_v31 = vld [vmem:[%s2066_s2 + $0x70] sm:$0xff]   ;;  %v1357_v32 = vld [vmem:[%s2066_s2 + $0x78] sm:$0xff]   ;;  %v1360_v52 = vld [vmem:[%s2067_s0 + $0x4] ss:$8 sps:$4 sm:$0xff]  }
   0xc   :  { %251 = vmatprep.subr.bf16.mxu0 %v1327_v7  ;;  %717 = vmatprep.mubr.bf16.mxu1 %v1360_v52  ;;  %v848_v52 = vld [vmem:[%s2068_s1 + $0x10] sm:$0xff]  ;;  %v850_v46 = vld [vmem:[%s2068_s1 + $0x20] sm:$0xff]  ;;  %v853_v62 = vld [vmem:[%s2068_s1 + $0x38] sm:$0xff] }
   0xd   :  { %890 = vperm.xlu1 %1317, %v848_v52   ;;  %v851_v52 = vld [vmem:[%s2068_s1 + $0x28] sm:$0xff]  ;;  %v852_v3 = vld [vmem:[%s2068_s1 + $0x30] sm:$0xff] }
   0xf   :  { %252 = vmatpush1.bf16.msra.mxu0 %v1329_v8 }
  0x10   :  { %253 = vmatprep.subr.bf16.mxu0 %v1330_v9 }
  0x13   :  { %254 = vmatpush1.bf16.msra.mxu0 %v1332_v10 }
  0x14   :  { %255 = vmatprep.subr.bf16.mxu0 %v1333_v11 }
  0x17   :  { %256 = vmatpush1.bf16.msra.mxu0 %v1335_v12 }
  0x18   :  { %257 = vmatprep.subr.bf16.mxu0 %v1336_v13 }
  0x1b   :  { %258 = vmatpush1.bf16.msra.mxu0 %v1338_v14 }
  0x1c   :  { %259 = vmatprep.subr.bf16.mxu0 %v1339_v15 }
  0x1f   :  { %260 = vmatpush1.bf16.msra.mxu0 %v1341_v16 }
  0x22   :  { %278 = vmatmul.mubr.bf16.vlgmr.msra.gmra.mxu0 %v1342_v17 }
  0x23   :  { %287 = vmatprep.mubr.bf16.mxu0 %v1406_v1 }
  0x2a   :  { %288 = vmatmul.mubr.bf16.gmra.mxu0 %v1343_v18  ;;  %v849_v18 = vld [vmem:[%s2068_s1 + $0x18] sm:$0xff] }
  0x2b   :  { %297 = vmatprep.mubr.bf16.mxu0 %v1406_v1  ;;  %895 = vperm.xlu1 %1317, %v849_v18  }
  0x2f   :  { %905 = vperm.xlu1 %1317, %v851_v52   ;;  %v854_v52 = vld [vmem:[%s2068_s1 + $0x40] sm:$0xff] }
  0x32   :  { %298 = vmatmul.mubr.bf16.gmra.mxu0 %v1344_v19 }
  0x33   :  { %307 = vmatprep.mubr.bf16.mxu0 %v1406_v1  ;;  %915 = vperm.xlu1 %1317, %v853_v62   ;;  %v857_v62 = vld [vmem:[%s2068_s1 + $0x58] sm:$0xff] }
  0x3a   :  { %308 = vmatmul.mubr.bf16.gmra.mxu0 %v1345_v20 }
  0x3b   :  { %317 = vmatprep.mubr.bf16.mxu0 %v1406_v1 }
  0x42   :  { %318 = vmatmul.mubr.bf16.gmra.mxu0 %v1346_v21 }
  0x43   :  { %327 = vmatprep.mubr.bf16.mxu0 %v1406_v1 }
  0x4a   :  { %328 = vmatmul.mubr.bf16.gmra.mxu0 %v1347_v22 }
  0x4b   :  { %337 = vmatprep.mubr.bf16.mxu0 %v1406_v1 }
  0x52   :  { %338 = vmatmul.mubr.bf16.gmra.mxu0 %v1348_v23 }
  0x53   :  { %347 = vmatprep.mubr.bf16.mxu0 %v1406_v1 }
  0x5a   :  { %348 = vmatmul.mubr.bf16.gmra.mxu0 %v1349_v24 }
  0x5b   :  { %357 = vmatprep.mubr.bf16.mxu0 %v1406_v1 }
  0x62   :  { %358 = vmatmul.mubr.bf16.gmra.mxu0 %v1350_v25 }
  0x63   :  { %367 = vmatprep.mubr.bf16.mxu0 %v1406_v1 }
  0x6a   :  { %368 = vmatmul.mubr.bf16.gmra.mxu0 %v1351_v26 }
  0x6b   :  { %377 = vmatprep.mubr.bf16.mxu0 %v1406_v1 }
  0x72   :  { %378 = vmatmul.mubr.bf16.gmra.mxu0 %v1352_v27 }
  0x73   :  { %387 = vmatprep.mubr.bf16.mxu0 %v1406_v1 }
  0x7a   :  { %388 = vmatmul.mubr.bf16.gmra.mxu0 %v1353_v28 }
  0x7b   :  { %397 = vmatprep.mubr.bf16.mxu0 %v1406_v1 }
  0x82   :  { %398 = vmatmul.mubr.bf16.gmra.mxu0 %v1354_v29 }
  0x83   :  { %407 = vmatprep.mubr.bf16.mxu0 %v1406_v1 }
  0x8a   :  { %408 = vmatmul.mubr.bf16.gmra.mxu0 %v1355_v30 }
  0x8b   :  { %417 = vmatprep.mubr.bf16.mxu0 %v1406_v1 }
  0x92   :  { %418 = vmatmul.mubr.bf16.gmra.mxu0 %v1356_v31 }
  0x93   :  { %427 = vmatprep.mubr.bf16.mxu0 %v1406_v1 }
  0x9a   :  { %428 = vmatmul.mubr.bf16.gmra.mxu0 %v1357_v32  ;;  %v846_v32 = vld [vmem:[%s2068_s1] sm:$0xff] }
  0x9b   :  { %880 = vperm.xlu0 %1316, %v846_v32  }
  0xe2   :  { %v1551_v33 = vpop.f32.mrf.mxu0 }
  0xe4   :  { %v1553_v34 = vpop.f32.mrf.mxu0 }
  0xe6   :  { %v1555_v35 = vpop.f32.mrf.mxu0 }
  0xe8   :  { %v1559_v37 = vpop.f32.mrf.mxu0 }
  0xea   :  { %v1561_v38 = vpop.f32.mrf.mxu0 }
  0xec   :  { %v1563_v39 = vpop.f32.mrf.mxu0 }
  0xee   :  { %v1565_v40 = vpop.f32.mrf.mxu0 }
  0xf0   :  { %v1569_v42 = vpop.f32.mrf.mxu0 }
  0xf2   :  { %v1571_v43 = vpop.f32.mrf.mxu0 }
  0xf4   :  { %v1573_v44 = vpop.f32.mrf.mxu0 }
  0xf6   :  { %v1575_v45 = vpop.f32.mrf.mxu0 }
  0xf8   :  { %v1579_v47 = vpop.f32.mrf.mxu0 }
  0xfa   :  { %v1581_v48 = vpop.f32.mrf.mxu0 }
  0xfc   :  { %v1583_v49 = vpop.f32.mrf.mxu0 }
  0xfe   :  { %v1585_v50 = vpop.f32.mrf.mxu0 }
 0x100   :  { %v1592_v53 = vpop.f32.mrf.mxu0 }
 0x102   :  { %v1594_v54 = vpop.f32.mrf.mxu0 }
 0x104   :  { %v1596_v55 = vpop.f32.mrf.mxu0 }
 0x106   :  { %v1598_v56 = vpop.f32.mrf.mxu0 }
 0x108   :  { %v1602_v58 = vpop.f32.mrf.mxu0 }
 0x10a   :  { %v1604_v59 = vpop.f32.mrf.mxu0 }
 0x10c   :  { %v1606_v60 = vpop.f32.mrf.mxu0 }
 0x10e   :  { %v1608_v61 = vpop.f32.mrf.mxu0 }
 0x110   :  { %v1612_v63 = vpop.f32.mrf.mxu0 }
 0x112   :  { %v1614_v0 = vpop.f32.mrf.mxu0 }
 0x114   :  { %v1616_v1 = vpop.f32.mrf.mxu0 }
 0x116   :  { %v1618_v2 = vpop.f32.mrf.mxu0 }
 0x118   :  { %v1622_v4 = vpop.f32.mrf.mxu0 }
 0x11a   :  { %v1624_v5 = vpop.f32.mrf.mxu0 }
 0x11c   :  { %v1626_v6 = vpop.f32.mrf.mxu0 }
 0x11e   :  { %v353_v7 = vpop.f32.mrf.mxu0 }
 0x11f   :  { %v445_v8 = vpack.c.bf16 %v353_v7, %v1624_v5  ;;  %v847_v7 = vld [vmem:[%s2068_s1 + $0x8] sm:$0xff] }
 0x120   :  { %v1629_v9 = vpop.f32.mrf.mxu0  ;;  %885 = vperm.xlu0 %1316, %v847_v7  }
 0x122   :  { %v1631_v10 = vpop.f32.mrf.mxu0 }
 0x124   :  { %v1633_v11 = vpop.f32.mrf.mxu0  ;;  %900 = vperm.xlu0 %1316, %v850_v46   ;;  %v855_v46 = vld [vmem:[%s2068_s1 + $0x48] sm:$0xff] }
 0x125   :  { %925 = vperm.xlu1 %1317, %v855_v46   ;;  %v859_v46 = vld [vmem:[%s2068_s1 + $0x68] sm:$0xff] }
 0x126   :  { %v1635_v12 = vpop.f32.mrf.mxu0 }
 0x128   :  { %v1639_v14 = vpop.f32.mrf.mxu0  ;;  %910 = vperm.xlu0 %1316, %v852_v3   ;;  %v856_v3 = vld [vmem:[%s2068_s1 + $0x50] sm:$0xff] }
 0x129   :  { %935 = vperm.xlu1 %1317, %v857_v62   ;;  %v877_v62 = vld [vmem:[%s2068_s1 + $0xf8] sm:$0xff] }
 0x12a   :  { %v1641_v15 = vpop.f32.mrf.mxu0 }
 0x12c   :  { %v1643_v16 = vpop.f32.mrf.mxu0  ;;  %920 = vperm.xlu0 %1316, %v854_v52   ;;  %v1364_v52 = vld [vmem:[%s2067_s0 + $0x24] ss:$8 sps:$4 sm:$0xff]  }
 0x12d   :  { %945 = vperm.xlu1 %1317, %v859_v46   ;;  %v1366_v46 = vld [vmem:[%s2067_s0 + $0x20] ss:$8 sps:$4 sm:$0xff]  }
 0x12e   :  { %v1645_v17 = vpop.f32.mrf.mxu0 }
 0x130   :  { %v1649_v19 = vpop.f32.mrf.mxu0  ;;  %930 = vperm.xlu0 %1316, %v856_v3   ;;  %v876_v3 = vld [vmem:[%s2068_s1 + $0xf0] sm:$0xff] }
 0x132   :  { %v1651_v20 = vpop.f32.mrf.mxu0 }
 0x134   :  { %v1653_v21 = vpop.f32.mrf.mxu0 }
 0x136   :  { %v1655_v22 = vpop.f32.mrf.mxu0 }
 0x138   :  { %v1657_v23 = vpop.f32.mrf.mxu0 }
 0x13a   :  { %v1659_v24 = vpop.f32.mrf.mxu0 }
 0x13c   :  { %v1661_v25 = vpop.f32.mrf.mxu0 }
 0x13e   :  { %v1663_v26 = vpop.f32.mrf.mxu0 }
 0x140   :  { %v1665_v27 = vpop.f32.mrf.mxu0 }
 0x142   :  { %v399_v28 = vpop.f32.mrf.mxu0 }
 0x144   :  { %v1667_v29 = vpop.f32.mrf.mxu0 }
 0x146   :  { %v403_v30 = vpop.f32.mrf.mxu0 }
 0x148   :  { %v1669_v31 = vpop.f32.mrf.mxu0 }
 0x14a   :  { %v409_v5 = vpop.f32.mrf.mxu0 }
 0x14c   :  { %v1680_v36 = vpop.f32.mrf.mxu0 }
 0x14d   :  { %2071 = vst [vmem:[#allocation2_spill] sm:$0xff] %v1680_v36 }
 0x14e   :  { %v413_v13 = vpop.f32.mrf.mxu0 }
 0x150   :  { %v1682_v41 = vpop.f32.mrf.mxu0 }
 0x151   :  { %2072 = vst [vmem:[#allocation3_spill] sm:$0xff] %v1682_v41 }
 0x152   :  { %v419_v32 = vpop.f32.mrf.mxu0 }
 0x154   :  { %v1693_v51 = vpop.f32.mrf.mxu0 }
 0x155   :  { %2073 = vst [vmem:[#allocation4_spill] sm:$0xff] %v1693_v51 }
 0x156   :  { %v423_v7 = vpop.f32.mrf.mxu0 }
 0x157   :  { %v452_v36 = vpack.c.bf16 %v423_v7, %v419_v32  ;;  %v2075_v32 = vpack.c.bf16 %v1618_v2, %v1614_v0  ;;  %v860_v7 = vld [vmem:[%s2068_s1 + $0x70] sm:$0xff]  ;;  %v863_v0 = vld [vmem:[%s2068_s1 + $0x88] sm:$0xff]  ;;  %v862_v2 = vld [vmem:[%s2068_s1 + $0x80] sm:$0xff] }
 0x158   :  { %v1695_v57 = vpop.f32.mrf.mxu0 }
 0x159   :  { %2074 = vst [vmem:[#allocation5_spill] sm:$0xff] %v1695_v57 }
 0x15a   :  { %v429_v18 = vpop.f32.mrf.mxu0 }
 0x15c   :  { %v1709_v57 = vpop.f32.mrf.mxu0 }
 0x15e   :  { %v433_v51 = vpop.f32.mrf.mxu0 }
 0x15f   :  { %v453_v41 = vpack.c.bf16 %v433_v51, %v429_v18  ;;  %v451_v51 = vpack.c.bf16 %v413_v13, %v409_v5  ;;  %v2076_v18 = vpack.c.bf16 %v1608_v61, %v1604_v59  ;;  %v449_v13 = vpack.c.bf16 %v1663_v26, %v1659_v24  ;;  %v865_v61 = vld [vmem:[%s2068_s1 + $0x98] sm:$0xff] }
 0x160   :  { %v448_v59 = vpack.c.bf16 %v1655_v22, %v1651_v20  ;;  %v2078_v24 = vpack.c.bf16 %v1585_v50, %v1581_v48  ;;  %v2079_v20 = vpack.c.bf16 %v1575_v45, %v1571_v43  ;;  %v2080_v48 = vpack.c.bf16 %v1645_v17, %v1641_v15  ;;  %v869_v50 = vld [vmem:[%s2068_s1 + $0xb8] sm:$0xff]  ;;  %v868_v22 = vld [vmem:[%s2068_s1 + $0xb0] sm:$0xff]  ;;  %v871_v45 = vld [vmem:[%s2068_s1 + $0xc8] sm:$0xff] }
 0x161   :  { %1203 = vmatprep.subr.bf16.mxu1 %v453_v41  ;;  %v858_v41 = vld [vmem:[%s2068_s1 + $0x60] sm:$0xff]  ;;  %v2081_v26 = vpack.c.bf16 %v1565_v40, %v1561_v38  ;;  %v2082_v43 = vpack.c.bf16 %v1635_v12, %v1631_v10  ;;  %v2083_v38 = vpack.c.bf16 %v1555_v35, %v1551_v33  ;;  %v1361_v40 = vld [vmem:[%s2067_s0 + $0x14] ss:$8 sps:$4 sm:$0xff]   ;;  %v875_v33 = vld [vmem:[%s2068_s1 + $0xe8] sm:$0xff] }
 0x162   :  { %1204 = vmatpush3.bf16.msra.mxu1 %v445_v8  ;;  %940 = vperm.xlu0 %1316, %v858_v41   ;;  %v450_v8 = vpack.c.bf16 %v403_v30, %v399_v28  ;;  %v2077_v28 = vpack.c.bf16 %v1598_v56, %v1594_v54  ;;  %v864_v30 = vld [vmem:[%s2068_s1 + $0x90] sm:$0xff]  ;;  %v867_v54 = vld [vmem:[%s2068_s1 + $0xa8] sm:$0xff]  ;;  %v866_v56 = vld [vmem:[%s2068_s1 + $0xa0] sm:$0xff] }
 0x163   :  { %1205 = vmatprep.subr.bf16.mxu1 %v452_v36  ;;  %v861_v36 = vld [vmem:[%s2068_s1 + $0x78] sm:$0xff]  ;;  %v870_v15 = vld [vmem:[%s2068_s1 + $0xc0] sm:$0xff]  ;;  %v872_v12 = vld [vmem:[%s2068_s1 + $0xd0] sm:$0xff] }
 0x164   :  { %955 = vperm.xlu1 %1317, %v861_v36   ;;  %v1358_v17 = vld [vmem:[%s2067_s0] ss:$8 sps:$4 sm:$0xff]   ;;  %v873_v10 = vld [vmem:[%s2068_s1 + $0xd8] sm:$0xff] }
 0x165   :  { %v874_v35 = vld [vmem:[%s2068_s1 + $0xe0] sm:$0xff]  ;;  %v1363_v5 = vld [vmem:[%s2067_s0 + $0x10] ss:$8 sps:$4 sm:$0xff]   ;;  %v1367_v41 = vld [vmem:[%s2067_s0 + $0x34] ss:$8 sps:$4 sm:$0xff]  }
 0x166   :  { %1206 = vmatpush3.bf16.msra.mxu1 %v2075_v32  ;;  %950 = vperm.xlu0 %1316, %v860_v7   ;;  %v1370_v32 = vld [vmem:[%s2067_s0 + $0x44] ss:$8 sps:$4 sm:$0xff]   ;;  %v1373_v36 = vld [vmem:[%s2067_s0 + $0x54] ss:$8 sps:$4 sm:$0xff]   ;;  %v1375_v7 = vld [vmem:[%s2067_s0 + $0x50] ss:$8 sps:$4 sm:$0xff]  }
 0x167   :  { %1207 = vmatprep.subr.bf16.mxu1 %v451_v51  ;;  %v1369_v51 = vld [vmem:[%s2067_s0 + $0x30] ss:$8 sps:$4 sm:$0xff]  }
 0x168   :  { %965 = vperm.xlu1 %1317, %v863_v0   ;;  %v1378_v0 = vld [vmem:[%s2067_s0 + $0x60] ss:$8 sps:$4 sm:$0xff]  }
 0x16a   :  { %1208 = vmatpush3.bf16.msra.mxu1 %v2076_v18  ;;  %960 = vperm.xlu0 %1316, %v862_v2   ;;  %v1376_v18 = vld [vmem:[%s2067_s0 + $0x64] ss:$8 sps:$4 sm:$0xff]   ;;  %v1379_v2 = vld [vmem:[%s2067_s0 + $0x74] ss:$8 sps:$4 sm:$0xff]  }
 0x16b   :  { %1209 = vmatprep.subr.bf16.mxu1 %v450_v8  ;;  %v1372_v8 = vld [vmem:[%s2067_s0 + $0x40] ss:$8 sps:$4 sm:$0xff]  }
 0x16c   :  { %975 = vperm.xlu1 %1317, %v865_v61   ;;  %v1385_v61 = vld [vmem:[%s2067_s0 + $0x94] ss:$8 sps:$4 sm:$0xff]  }
 0x16e   :  { %1210 = vmatpush3.bf16.msra.mxu1 %v2077_v28  ;;  %970 = vperm.xlu0 %1316, %v864_v30   ;;  %v1382_v28 = vld [vmem:[%s2067_s0 + $0x84] ss:$8 sps:$4 sm:$0xff]   ;;  %v1387_v30 = vld [vmem:[%s2067_s0 + $0x90] ss:$8 sps:$4 sm:$0xff]  }
 0x16f   :  { %1211 = vmatprep.subr.bf16.mxu1 %v449_v13  ;;  %v1381_v13 = vld [vmem:[%s2067_s0 + $0x70] ss:$8 sps:$4 sm:$0xff]  }
 0x170   :  { %985 = vperm.xlu1 %1317, %v867_v54   ;;  %v1390_v54 = vld [vmem:[%s2067_s0 + $0xa0] ss:$8 sps:$4 sm:$0xff]  }
 0x172   :  { %1212 = vmatpush3.bf16.msra.mxu1 %v2078_v24  ;;  %980 = vperm.xlu0 %1316, %v866_v56   ;;  %v1388_v24 = vld [vmem:[%s2067_s0 + $0xa4] ss:$8 sps:$4 sm:$0xff]   ;;  %v1391_v56 = vld [vmem:[%s2067_s0 + $0xb4] ss:$8 sps:$4 sm:$0xff]  }
 0x173   :  { %1213 = vmatprep.subr.bf16.mxu1 %v448_v59  ;;  %v1384_v59 = vld [vmem:[%s2067_s0 + $0x80] ss:$8 sps:$4 sm:$0xff]  }
 0x174   :  { %995 = vperm.xlu1 %1317, %v869_v50   ;;  %v1396_v50 = vld [vmem:[%s2067_s0 + $0xc0] ss:$8 sps:$4 sm:$0xff]  }
 0x176   :  { %1214 = vmatpush3.bf16.msra.mxu1 %v2079_v20  ;;  %990 = vperm.xlu0 %1316, %v868_v22   ;;  %v1393_v20 = vld [vmem:[%s2067_s0 + $0xb0] ss:$8 sps:$4 sm:$0xff]   ;;  %v1397_v22 = vld [vmem:[%s2067_s0 + $0xd4] ss:$8 sps:$4 sm:$0xff]  }
 0x177   :  { %1215 = vmatprep.subr.bf16.mxu1 %v2080_v48  ;;  %v1394_v48 = vld [vmem:[%s2067_s0 + $0xc4] ss:$8 sps:$4 sm:$0xff]  }
 0x178   :  { %1005 = vperm.xlu1 %1317, %v871_v45   ;;  %v1402_v45 = vld [vmem:[%s2067_s0 + $0xe0] ss:$8 sps:$4 sm:$0xff]  }
 0x17a   :  { %1216 = vmatpush3.bf16.msra.mxu1 %v2081_v26  ;;  %1000 = vperm.xlu0 %1316, %v870_v15   ;;  %v1399_v26 = vld [vmem:[%s2067_s0 + $0xd0] ss:$8 sps:$4 sm:$0xff]   ;;  %v1403_v15 = vld [vmem:[%s2067_s0 + $0xf4] ss:$8 sps:$4 sm:$0xff]  }
 0x17b   :  { %1217 = vmatprep.subr.bf16.mxu1 %v2082_v43  ;;  %v1400_v43 = vld [vmem:[%s2067_s0 + $0xe4] ss:$8 sps:$4 sm:$0xff]  }
 0x17c   :  { %1015 = vperm.xlu1 %1317, %v873_v10   ;;  %v1904_v10 = vld [vmem:[%s2069_s4] ss:$0 sm:$0xff] }
 0x17e   :  { %1218 = vmatpush3.bf16.msra.mxu1 %v2083_v38  ;;  %1010 = vperm.xlu0 %1316, %v872_v12  }
 0x180   :  { %1025 = vperm.xlu1 %1317, %v875_v33  }
 0x181   :  { %718 = vmatmul.mubr.bf16.vlgmr.msra.gmra.mxu1 %v1358_v17  ;;  %v1405_v17 = vld [vmem:[%s2067_s0 + $0xf0] ss:$8 sps:$4 sm:$0xff]  }
 0x182   :  { %725 = vmatprep.mubr.bf16.mxu1 %v1361_v40  ;;  %1020 = vperm.xlu0 %1316, %v874_v35   ;;  %v881_v40 = vpop.permute.xlu0 %880 }
 0x184   :  { %1035 = vperm.xlu1 %1317, %v877_v62  }
 0x186   :  { %1030 = vperm.xlu0 %1316, %v876_v3  }
 0x189   :  { %726 = vmatmul.mubr.bf16.gmra.mxu1 %v1363_v5  ;;  %v461_v5 = vadd.f32 %v1904_v10, %v1553_v34  ;;  %v463_v34 = vadd.f32 %v1904_v10, %v1563_v39 }
 0x18a   :  { %733 = vmatprep.mubr.bf16.mxu1 %v1364_v52 }
 0x191   :  { %734 = vmatmul.mubr.bf16.gmra.mxu1 %v1366_v46 }
 0x192   :  { %741 = vmatprep.mubr.bf16.mxu1 %v1367_v41 }
 0x199   :  { %742 = vmatmul.mubr.bf16.gmra.mxu1 %v1369_v51 }
 0x19a   :  { %749 = vmatprep.mubr.bf16.mxu1 %v1370_v32  ;;  %v462_v32 = vadd.f32 %v1904_v10, %v1559_v37 }
 0x19b   :  { %v886_v3 = vpop.permute.xlu0 %885 }
 0x1a1   :  { %750 = vmatmul.mubr.bf16.gmra.mxu1 %v1372_v8 }
 0x1a2   :  { %757 = vmatprep.mubr.bf16.mxu1 %v1373_v36  ;;  %v891_v36 = vpop.permute.xlu1 %890 }
 0x1a9   :  { %758 = vmatmul.mubr.bf16.gmra.mxu1 %v1375_v7 }
 0x1aa   :  { %765 = vmatprep.mubr.bf16.mxu1 %v1376_v18 }
 0x1b1   :  { %766 = vmatmul.mubr.bf16.gmra.mxu1 %v1378_v0 }
 0x1b2   :  { %773 = vmatprep.mubr.bf16.mxu1 %v1379_v2 }
 0x1b9   :  { %774 = vmatmul.mubr.bf16.gmra.mxu1 %v1381_v13 }
 0x1ba   :  { %781 = vmatprep.mubr.bf16.mxu1 %v1382_v28 }
 0x1c1   :  { %782 = vmatmul.mubr.bf16.gmra.mxu1 %v1384_v59 }
 0x1c2   :  { %789 = vmatprep.mubr.bf16.mxu1 %v1385_v61  ;;  %v896_v61 = vpop.permute.xlu1 %895 }
 0x1c9   :  { %790 = vmatmul.mubr.bf16.gmra.mxu1 %v1387_v30 }
 0x1ca   :  { %797 = vmatprep.mubr.bf16.mxu1 %v1388_v24  ;;  %v464_v24 = vadd.f32 %v1904_v10, %v1569_v42 }
 0x1d1   :  { %798 = vmatmul.mubr.bf16.gmra.mxu1 %v1390_v54 }
 0x1d2   :  { %805 = vmatprep.mubr.bf16.mxu1 %v1391_v56 }
 0x1d9   :  { %806 = vmatmul.mubr.bf16.gmra.mxu1 %v1393_v20 }
 0x1da   :  { %813 = vmatprep.mubr.bf16.mxu1 %v1394_v48  ;;  %v901_v48 = vpop.permute.xlu0 %900 }
 0x1e1   :  { %814 = vmatmul.mubr.bf16.gmra.mxu1 %v1396_v50 }
 0x1e2   :  { %821 = vmatprep.mubr.bf16.mxu1 %v1397_v22  ;;  %v465_v22 = vadd.f32 %v1904_v10, %v1573_v44 }
 0x1e9   :  { %822 = vmatmul.mubr.bf16.gmra.mxu1 %v1399_v26 }
 0x1ea   :  { %829 = vmatprep.mubr.bf16.mxu1 %v1400_v43 }
 0x1f1   :  { %830 = vmatmul.mubr.bf16.gmra.mxu1 %v1402_v45 }
 0x1f2   :  { %837 = vmatprep.mubr.bf16.mxu1 %v1403_v15  ;;  %v906_v15 = vpop.permute.xlu1 %905 }
 0x1f9   :  { %838 = vmatmul.mubr.bf16.gmra.mxu1 %v1405_v17 }
 0x241   :  { %v1219_v38 = vpop.f32.mrf.mxu1 }
 0x243   :  { %v1220_v12 = vpop.f32.mrf.mxu1 }
 0x244   :  { %v1221_v33 = vadd.f32 %v1220_v12, %v1219_v38  ;;  %v466_v38 = vadd.f32 %v1904_v10, %v1579_v47 }
 0x245   :  { %v1222_v35 = vpop.f32.mrf.mxu1 }
 0x246   :  { %v1038_v52 = vmul.f32 %v1221_v33, %v881_v40 }
 0x247   :  { %v1223_v62 = vpop.f32.mrf.mxu1 }
 0x248   :  { %v1070_v46 = vadd.f32 %v1038_v52, %v461_v5  ;;  %v1224_v41 = vadd.f32 %v1223_v62, %v1222_v35  ;;  %v911_v35 = vpop.permute.xlu0 %910  ;;  %v467_v52 = vadd.f32 %v1904_v10, %v1583_v49 }
 0x249   :  { %v1225_v51 = vpop.f32.mrf.mxu1 }
 0x24a   :  { %1102 = vst [vmem:[%s2070_s5] sm:$0xff] %v1070_v46  ;;  %v1039_v8 = vmul.f32 %v1224_v41, %v886_v3  ;;  %v916_v41 = vpop.permute.xlu1 %915 }
 0x24b   :  { %v1226_v7 = vpop.f32.mrf.mxu1 }
 0x24c   :  { %v1071_v18 = vadd.f32 %v1039_v8, %v462_v32  ;;  %v1227_v0 = vadd.f32 %v1226_v7, %v1225_v51  ;;  %v468_v32 = vadd.f32 %v1904_v10, %v1592_v53 }
 0x24d   :  { %v1228_v2 = vpop.f32.mrf.mxu1 }
 0x24e   :  { %1103 = vst [vmem:[%s2070_s5 + $0x8] sm:$0xff] %v1071_v18  ;;  %v1040_v13 = vmul.f32 %v1227_v0, %v891_v36  ;;  %v921_v18 = vpop.permute.xlu0 %920 }
 0x24f   :  { %v1229_v28 = vpop.f32.mrf.mxu1 }
 0x250   :  { %v1072_v37 = vadd.f32 %v1040_v13, %v463_v34  ;;  %v1230_v59 = vadd.f32 %v1229_v28, %v1228_v2  ;;  %v469_v2 = vadd.f32 %v1904_v10, %v1596_v55 }
 0x251   :  { %v1231_v30 = vpop.f32.mrf.mxu1 }
 0x252   :  { %1104 = vst [vmem:[%s2070_s5 + $0x10] sm:$0xff] %v1072_v37  ;;  %v1041_v54 = vmul.f32 %v1230_v59, %v896_v61  ;;  %v926_v37 = vpop.permute.xlu1 %925  ;;  %v470_v61 = vadd.f32 %v1904_v10, %v1602_v58 }
 0x253   :  { %v1232_v56 = vpop.f32.mrf.mxu1 }
 0x254   :  { %v1073_v39 = vadd.f32 %v1041_v54, %v464_v24  ;;  %v1233_v20 = vadd.f32 %v1232_v56, %v1231_v30  ;;  %v931_v56 = vpop.permute.xlu0 %930 }
 0x255   :  { %v1234_v50 = vpop.f32.mrf.mxu1 }
 0x256   :  { %1105 = vst [vmem:[%s2070_s5 + $0x18] sm:$0xff] %v1073_v39  ;;  %v1042_v26 = vmul.f32 %v1233_v20, %v901_v48  ;;  %v471_v20 = vadd.f32 %v1904_v10, %v1606_v60 }
 0x257   :  { %v1235_v43 = vpop.f32.mrf.mxu1 }
 0x258   :  { %v1074_v42 = vadd.f32 %v1042_v26, %v465_v22  ;;  %v1236_v45 = vadd.f32 %v1235_v43, %v1234_v50  ;;  %v936_v26 = vpop.permute.xlu1 %935 }
 0x259   :  { %v1237_v17 = vpop.f32.mrf.mxu1 }
 0x25a   :  { %1106 = vst [vmem:[%s2070_s5 + $0x20] sm:$0xff] %v1074_v42  ;;  %v1043_v40 = vmul.f32 %v1236_v45, %v906_v15  ;;  %v472_v42 = vadd.f32 %v1904_v10, %v1612_v63 }
 0x25b   :  { %v1238_v12 = vpop.f32.mrf.mxu1 }
 0x25c   :  { %v1075_v44 = vadd.f32 %v1043_v40, %v466_v38  ;;  %v1239_v33 = vadd.f32 %v1238_v12, %v1237_v17  ;;  %v941_v38 = vpop.permute.xlu0 %940  ;;  %v473_v12 = vadd.f32 %v1904_v10, %v1616_v1 }
 0x25d   :  { %v1240_v5 = vpop.f32.mrf.mxu1 }
 0x25e   :  { %1107 = vst [vmem:[%s2070_s5 + $0x28] sm:$0xff] %v1075_v44  ;;  %v1044_v62 = vmul.f32 %v1239_v33, %v911_v35 }
 0x25f   :  { %v1241_v3 = vpop.f32.mrf.mxu1 }
 0x260   :  { %v1076_v47 = vadd.f32 %v1044_v62, %v467_v52  ;;  %v1242_v46 = vadd.f32 %v1241_v3, %v1240_v5  ;;  %v946_v5 = vpop.permute.xlu1 %945  ;;  %v474_v62 = vadd.f32 %v1904_v10, %v1622_v4 }
 0x261   :  { %v1243_v51 = vpop.f32.mrf.mxu1 }
 0x262   :  { %1108 = vst [vmem:[%s2070_s5 + $0x30] sm:$0xff] %v1076_v47  ;;  %v1045_v8 = vmul.f32 %v1242_v46, %v916_v41  ;;  %v951_v41 = vpop.permute.xlu0 %950 }
 0x263   :  { %v1244_v36 = vpop.f32.mrf.mxu1 }
 0x264   :  { %v1077_v49 = vadd.f32 %v1045_v8, %v468_v32  ;;  %v1245_v7 = vadd.f32 %v1244_v36, %v1243_v51  ;;  %v475_v32 = vadd.f32 %v1904_v10, %v1626_v6 }
 0x265   :  { %v1246_v0 = vpop.f32.mrf.mxu1 }
 0x266   :  { %1109 = vst [vmem:[%s2070_s5 + $0x38] sm:$0xff] %v1077_v49  ;;  %v1046_v34 = vmul.f32 %v1245_v7, %v921_v18  ;;  %v956_v7 = vpop.permute.xlu1 %955 }
 0x267   :  { %v1247_v13 = vpop.f32.mrf.mxu1 }
 0x268   :  { %v1078_v53 = vadd.f32 %v1046_v34, %v469_v2  ;;  %v1248_v28 = vadd.f32 %v1247_v13, %v1246_v0  ;;  %v476_v0 = vadd.f32 %v1904_v10, %v1629_v9 }
 0x269   :  { %v1249_v59 = vpop.f32.mrf.mxu1 }
 0x26a   :  { %1110 = vst [vmem:[%s2070_s5 + $0x40] sm:$0xff] %v1078_v53  ;;  %v1047_v30 = vmul.f32 %v1248_v28, %v926_v37  ;;  %v961_v53 = vpop.permute.xlu0 %960  ;;  %v477_v37 = vadd.f32 %v1904_v10, %v1633_v11 }
 0x26b   :  { %v1250_v24 = vpop.f32.mrf.mxu1 }
 0x26c   :  { %v1079_v55 = vadd.f32 %v1047_v30, %v470_v61  ;;  %v1251_v54 = vadd.f32 %v1250_v24, %v1249_v59  ;;  %v966_v24 = vpop.permute.xlu1 %965 }
 0x26d   :  { %v1252_v39 = vpop.f32.mrf.mxu1 }
 0x26e   :  { %1111 = vst [vmem:[%s2070_s5 + $0x48] sm:$0xff] %v1079_v55  ;;  %v1048_v48 = vmul.f32 %v1251_v54, %v931_v56  ;;  %v478_v54 = vadd.f32 %v1904_v10, %v1639_v14 }
 0x26f   :  { %v1253_v50 = vpop.f32.mrf.mxu1 }
 0x270   :  { %v1080_v58 = vadd.f32 %v1048_v48, %v471_v20  ;;  %v1254_v22 = vadd.f32 %v1253_v50, %v1252_v39  ;;  %v971_v48 = vpop.permute.xlu0 %970 }
 0x271   :  { %v1255_v43 = vpop.f32.mrf.mxu1 }
 0x272   :  { %1112 = vst [vmem:[%s2070_s5 + $0x50] sm:$0xff] %v1080_v58  ;;  %v1049_v45 = vmul.f32 %v1254_v22, %v936_v26  ;;  %v479_v58 = vadd.f32 %v1904_v10, %v1643_v16 }
 0x273   :  { %v1256_v15 = vpop.f32.mrf.mxu1 }
 0x274   :  { %v1081_v60 = vadd.f32 %v1049_v45, %v472_v42  ;;  %v1257_v17 = vadd.f32 %v1256_v15, %v1255_v43  ;;  %v976_v42 = vpop.permute.xlu1 %975  ;;  %v480_v15 = vadd.f32 %v1904_v10, %v1649_v19 }
 0x275   :  { %v1258_v40 = vpop.f32.mrf.mxu1 }
 0x276   :  { %1113 = vst [vmem:[%s2070_s5 + $0x58] sm:$0xff] %v1081_v60  ;;  %v1050_v44 = vmul.f32 %v1257_v17, %v941_v38 }
 0x277   :  { %v1259_v33 = vpop.f32.mrf.mxu1 }
 0x278   :  { %v1082_v63 = vadd.f32 %v1050_v44, %v473_v12  ;;  %v1260_v35 = vadd.f32 %v1259_v33, %v1258_v40  ;;  %v981_v40 = vpop.permute.xlu0 %980  ;;  %v481_v44 = vadd.f32 %v1904_v10, %v1653_v21 }
 0x279   :  { %v1261_v52 = vpop.f32.mrf.mxu1 }
 0x27a   :  { %1114 = vst [vmem:[%s2070_s5 + $0x60] sm:$0xff] %v1082_v63  ;;  %v1051_v3 = vmul.f32 %v1260_v35, %v946_v5  ;;  %v986_v5 = vpop.permute.xlu1 %985 }
 0x27b   :  { %v1262_v47 = vpop.f32.mrf.mxu1 }
 0x27c   :  { %v1083_v1 = vadd.f32 %v1051_v3, %v474_v62  ;;  %v1263_v46 = vadd.f32 %v1262_v47, %v1261_v52  ;;  %v482_v62 = vadd.f32 %v1904_v10, %v1657_v23 }
 0x27d   :  { %v1264_v51 = vpop.f32.mrf.mxu1 }
 0x27e   :  { %1115 = vst [vmem:[%s2070_s5 + $0x68] sm:$0xff] %v1083_v1  ;;  %v1052_v8 = vmul.f32 %v1263_v46, %v951_v41  ;;  %v991_v46 = vpop.permute.xlu0 %990 }
 0x27f   :  { %v1265_v36 = vpop.f32.mrf.mxu1 }
 0x280   :  { %v1084_v4 = vadd.f32 %v1052_v8, %v475_v32  ;;  %v1266_v49 = vadd.f32 %v1265_v36, %v1264_v51  ;;  %v483_v51 = vadd.f32 %v1904_v10, %v1661_v25 }
 0x281   :  { %v1267_v18 = vpop.f32.mrf.mxu1 }
 0x282   :  { %1116 = vst [vmem:[%s2070_s5 + $0x70] sm:$0xff] %v1084_v4  ;;  %v1053_v2 = vmul.f32 %v1266_v49, %v956_v7  ;;  %v996_v4 = vpop.permute.xlu1 %995  ;;  %v484_v7 = vadd.f32 %v1904_v10, %v1665_v27 }
 0x283   :  { %v1268_v34 = vpop.f32.mrf.mxu1 }
 0x284   :  { %v1085_v6 = vadd.f32 %v1053_v2, %v476_v0  ;;  %v1269_v13 = vadd.f32 %v1268_v34, %v1267_v18  ;;  %v1001_v34 = vpop.permute.xlu0 %1000 }
 0x285   :  { %v1270_v28 = vpop.f32.mrf.mxu1 }
 0x286   :  { %1117 = vst [vmem:[%s2070_s5 + $0x78] sm:$0xff] %v1085_v6  ;;  %v1054_v59 = vmul.f32 %v1269_v13, %v961_v53  ;;  %v485_v13 = vadd.f32 %v1904_v10, %v1667_v29 }
 0x287   :  { %v1271_v61 = vpop.f32.mrf.mxu1 }
 0x288   :  { %v1086_v9 = vadd.f32 %v1054_v59, %v477_v37  ;;  %v1272_v30 = vadd.f32 %v1271_v61, %v1270_v28  ;;  %v1006_v59 = vpop.permute.xlu1 %1005 }
 0x289   :  { %v1273_v55 = vpop.f32.mrf.mxu1 }
 0x28a   :  { %1118 = vst [vmem:[%s2070_s5 + $0x80] sm:$0xff] %v1086_v9  ;;  %v1055_v56 = vmul.f32 %v1272_v30, %v966_v24  ;;  %v486_v9 = vadd.f32 %v1904_v10, %v1669_v31 }
 0x28b   :  { %v1274_v39 = vpop.f32.mrf.mxu1 }
 0x28c   :  { %v1087_v11 = vadd.f32 %v1055_v56, %v478_v54  ;;  %v1275_v20 = vadd.f32 %v1274_v39, %v1273_v55  ;;  %v1011_v54 = vpop.permute.xlu0 %1010  ;;  %v2084_v39 = vld [vmem:[#allocation2_spill] sm:$0xff] }
 0x28d   :  { %v1276_v50 = vpop.f32.mrf.mxu1 }
 0x28e   :  { %1119 = vst [vmem:[%s2070_s5 + $0x88] sm:$0xff] %v1087_v11  ;;  %v1056_v22 = vmul.f32 %v1275_v20, %v971_v48  ;;  %v487_v11 = vadd.f32 %v1904_v10, %v2084_v39 }
 0x28f   :  { %v1277_v26 = vpop.f32.mrf.mxu1 }
 0x290   :  { %v1088_v14 = vadd.f32 %v1056_v22, %v479_v58  ;;  %v1278_v43 = vadd.f32 %v1277_v26, %v1276_v50  ;;  %v1016_v58 = vpop.permute.xlu1 %1015  ;;  %v2085_v26 = vld [vmem:[#allocation3_spill] sm:$0xff] }
 0x291   :  { %v1279_v45 = vpop.f32.mrf.mxu1 }
 0x292   :  { %1120 = vst [vmem:[%s2070_s5 + $0x90] sm:$0xff] %v1088_v14  ;;  %v1057_v60 = vmul.f32 %v1278_v43, %v976_v42  ;;  %v488_v14 = vadd.f32 %v1904_v10, %v2085_v26 }
 0x293   :  { %v1280_v17 = vpop.f32.mrf.mxu1 }
 0x294   :  { %v1089_v16 = vadd.f32 %v1057_v60, %v480_v15  ;;  %v1281_v38 = vadd.f32 %v1280_v17, %v1279_v45  ;;  %v1021_v60 = vpop.permute.xlu0 %1020 }
 0x295   :  { %v1282_v12 = vpop.f32.mrf.mxu1 }
 0x296   :  { %1121 = vst [vmem:[%s2070_s5 + $0x98] sm:$0xff] %v1089_v16  ;;  %v1058_v33 = vmul.f32 %v1281_v38, %v981_v40  ;;  %v2086_v16 = vld [vmem:[#allocation4_spill] sm:$0xff] }
 0x297   :  { %v1283_v63 = vpop.f32.mrf.mxu1  ;;  %v489_v38 = vadd.f32 %v1904_v10, %v2086_v16 }
 0x298   :  { %v1090_v19 = vadd.f32 %v1058_v33, %v481_v44  ;;  %v1284_v35 = vadd.f32 %v1283_v63, %v1282_v12  ;;  %v1026_v63 = vpop.permute.xlu1 %1025 }
 0x299   :  { %v1285_v52 = vpop.f32.mrf.mxu1 }
 0x29a   :  { %1122 = vst [vmem:[%s2070_s5 + $0xa0] sm:$0xff] %v1090_v19  ;;  %v1059_v3 = vmul.f32 %v1284_v35, %v986_v5  ;;  %v2087_v35 = vld [vmem:[#allocation5_spill] sm:$0xff] }
 0x29b   :  { %v1286_v47 = vpop.f32.mrf.mxu1  ;;  %v490_v5 = vadd.f32 %v1904_v10, %v2087_v35 }
 0x29c   :  { %v1091_v21 = vadd.f32 %v1059_v3, %v482_v62  ;;  %v1287_v1 = vadd.f32 %v1286_v47, %v1285_v52 }
 0x29d   :  { %v1288_v41 = vpop.f32.mrf.mxu1 }
 0x29e   :  { %1123 = vst [vmem:[%s2070_s5 + $0xa8] sm:$0xff] %v1091_v21  ;;  %v1060_v32 = vmul.f32 %v1287_v1, %v991_v46  ;;  %v1031_v21 = vpop.permute.xlu0 %1030  ;;  %v491_v46 = vadd.f32 %v1904_v10, %v1709_v57 }
 0x29f   :  { %v1289_v8 = vpop.f32.mrf.mxu1 }
 0x2a0   :  { %v1092_v23 = vadd.f32 %v1060_v32, %v483_v51  ;;  %v1290_v36 = vadd.f32 %v1289_v8, %v1288_v41  ;;  %v435_v51 = vpop.f32.mrf.mxu0 }
 0x2a1   :  { %v1291_v49 = vpop.f32.mrf.mxu1 }
 0x2a2   :  { %1124 = vst [vmem:[%s2070_s5 + $0xb0] sm:$0xff] %v1092_v23  ;;  %v1061_v18 = vmul.f32 %v1290_v36, %v996_v4  ;;  %v1036_v36 = vpop.permute.xlu1 %1035  ;;  %v492_v4 = vadd.f32 %v1904_v10, %v435_v51 }
 0x2a3   :  { %v1292_v0 = vpop.f32.mrf.mxu1 }
 0x2a4   :  { %v1093_v25 = vadd.f32 %v1061_v18, %v484_v7  ;;  %v1293_v2 = vadd.f32 %v1292_v0, %v1291_v49 }
 0x2a5   :  { %v1294_v6 = vpop.f32.mrf.mxu1 }
 0x2a6   :  { %1125 = vst [vmem:[%s2070_s5 + $0xb8] sm:$0xff] %v1093_v25  ;;  %v1062_v53 = vmul.f32 %v1293_v2, %v1001_v34 }
 0x2a7   :  { %v1295_v28 = vpop.f32.mrf.mxu1 }
 0x2a8   :  { %v1094_v27 = vadd.f32 %v1062_v53, %v485_v13  ;;  %v1296_v37 = vadd.f32 %v1295_v28, %v1294_v6 }
 0x2a9   :  { %v1297_v61 = vpop.f32.mrf.mxu1 }
 0x2aa   :  { %1126 = vst [vmem:[%s2070_s5 + $0xc0] sm:$0xff] %v1094_v27  ;;  %v1063_v30 = vmul.f32 %v1296_v37, %v1006_v59 }
 0x2ab   :  { %v1298_v24 = vpop.f32.mrf.mxu1 }
 0x2ac   :  { %v1095_v29 = vadd.f32 %v1063_v30, %v486_v9  ;;  %v1299_v55 = vadd.f32 %v1298_v24, %v1297_v61 }
 0x2ad   :  { %v1300_v56 = vpop.f32.mrf.mxu1 }
 0x2ae   :  { %1127 = vst [vmem:[%s2070_s5 + $0xc8] sm:$0xff] %v1095_v29  ;;  %v1064_v20 = vmul.f32 %v1299_v55, %v1011_v54 }
 0x2af   :  { %v1301_v48 = vpop.f32.mrf.mxu1 }
 0x2b0   :  { %v1096_v31 = vadd.f32 %v1064_v20, %v487_v11  ;;  %v1302_v50 = vadd.f32 %v1301_v48, %v1300_v56 }
 0x2b1   :  { %v1303_v22 = vpop.f32.mrf.mxu1 }
 0x2b2   :  { %1128 = vst [vmem:[%s2070_s5 + $0xd0] sm:$0xff] %v1096_v31  ;;  %v1065_v43 = vmul.f32 %v1302_v50, %v1016_v58 }
 0x2b3   :  { %v1304_v42 = vpop.f32.mrf.mxu1 }
 0x2b4   :  { %v1097_v45 = vadd.f32 %v1065_v43, %v488_v14  ;;  %v1305_v15 = vadd.f32 %v1304_v42, %v1303_v22 }
 0x2b5   :  { %v1306_v17 = vpop.f32.mrf.mxu1 }
 0x2b6   :  { %1129 = vst [vmem:[%s2070_s5 + $0xd8] sm:$0xff] %v1097_v45  ;;  %v1066_v40 = vmul.f32 %v1305_v15, %v1021_v60 }
 0x2b7   :  { %v1307_v12 = vpop.f32.mrf.mxu1 }
 0x2b8   :  { %v1098_v44 = vadd.f32 %v1066_v40, %v489_v38  ;;  %v1308_v33 = vadd.f32 %v1307_v12, %v1306_v17 }
 0x2b9   :  { %v1309_v19 = vpop.f32.mrf.mxu1 }
 0x2ba   :  { %1130 = vst [vmem:[%s2070_s5 + $0xe0] sm:$0xff] %v1098_v44  ;;  %v1067_v52 = vmul.f32 %v1308_v33, %v1026_v63 }
 0x2bb   :  { %v1310_v62 = vpop.f32.mrf.mxu1 }
 0x2bc   :  { %v1099_v3 = vadd.f32 %v1067_v52, %v490_v5  ;;  %v1311_v47 = vadd.f32 %v1310_v62, %v1309_v19 }
 0x2bd   :  { %v1312_v1 = vpop.f32.mrf.mxu1 }
 0x2be   :  { %1131 = vst [vmem:[%s2070_s5 + $0xe8] sm:$0xff] %v1099_v3  ;;  %v1068_v41 = vmul.f32 %v1311_v47, %v1031_v21 }
 0x2bf   :  { %v1313_v32 = vpop.f32.mrf.mxu1 }
 0x2c0   :  { %v1100_v8 = vadd.f32 %v1068_v41, %v491_v46  ;;  %v1314_v23 = vadd.f32 %v1313_v32, %v1312_v1 }
 0x2c2   :  { %1132 = vst [vmem:[%s2070_s5 + $0xf0] sm:$0xff] %v1100_v8  ;;  %v1069_v49 = vmul.f32 %v1314_v23, %v1036_v36 }
 0x2c4   :  { %v1101_v7 = vadd.f32 %v1069_v49, %v492_v4 }
 0x2c6   :  { %1133 = vst [vmem:[%s2070_s5 + $0xf8] sm:$0xff] %v1101_v7 }

// kernel: sage_forward.2
= control target key start
LH: loop header
LB: loop body
LE: loop exit
PB: predicated region body
PF: predicated region fallthrough
CT: control target
= control target key end

     0   :  { %v1786_v1 = vmov 0   ;;  %vm181_vm0 = vcmask 523264   ;;  %s2351_s3 = inlined_call_operand.vmem [shape: bf16[64,256], index: 3, kind: input, shape index: {}]   ;;  %s2352_s2 = inlined_call_operand.vmem [shape: bf16[256,64], index: 2, kind: input, shape index: {}]   ;;  %s2353_s0 = inlined_call_operand.vmem [shape: bf16[256,256], index: 0, kind: input, shape index: {}]   ;;  %s2354_s1 = inlined_call_operand.vmem [shape: f32[256,1], index: 1, kind: input, shape index: {}]   ;;  %s2355_s4 = inlined_call_operand.vmem [shape: f32[1,128], index: 4, kind: input, shape index: {}]   ;;  %s2356_s5 = inlined_call_operand.vmem [shape: bf16[256,128], index: 5, kind: output, shape index: {}]  }
   0x1   :  { %v1710_v0 = vld [vmem:[%s2351_s3 + $0x34] ss:$8 sps:$4 sm:$0xff]   ;;  %262 = vmatprep.mubr.bf16.mxu0 %v1786_v1  ;;  %1709 = vset.pattern.permute.xlu1 %v1786_v1  ;;  %v1712_v2 = vld [vmem:[%s2351_s3 + $0x30] ss:$8 sps:$4 sm:$0xff]   ;;  %v1713_v3 = vld [vmem:[%s2351_s3 + $0x24] ss:$8 sps:$4 sm:$0xff]  }
   0x2   :  { %1708 = vset.pattern.permute.xlu0 %v1786_v1  ;;  %238 = vmatprep.subr.bf16.mxu0 %v1710_v0  ;;  %v1715_v4 = vld [vmem:[%s2351_s3 + $0x20] ss:$8 sps:$4 sm:$0xff]   ;;  %v1716_v5 = vld [vmem:[%s2351_s3 + $0x14] ss:$8 sps:$4 sm:$0xff]   ;;  %v1718_v6 = vld [vmem:[%s2351_s3 + $0x10] ss:$8 sps:$4 sm:$0xff]  }
   0x3   :  { %239 = vmatpush1.bf16.msra.mxu0 %v1712_v2  ;;  %v1719_v7 = vld [vmem:[%s2351_s3 + $0x4] ss:$8 sps:$4 sm:$0xff]   ;;  %v1721_v8 = vld [vmem:[%s2351_s3] ss:$8 sps:$4 sm:$0xff]   ;;  %v1724_v11 = vld [vmem:[%s2352_s2 + $0x10] sm:$0xff]  }
   0x4   :  { %240 = vmatprep.subr.bf16.mxu0 %v1713_v3  ;;  %v1722_v9 = vld [vmem:[%s2352_s2] sm:$0xff]   ;;  %v1723_v10 = vld [vmem:[%s2352_s2 + $0x8] sm:$0xff]   ;;  %v1725_v12 = vld [vmem:[%s2352_s2 + $0x18] sm:$0xff]  }
   0x5   :  { %v1726_v13 = vld [vmem:[%s2352_s2 + $0x20] sm:$0xff]   ;;  %v1727_v14 = vld [vmem:[%s2352_s2 + $0x28] sm:$0xff]   ;;  %v1728_v15 = vld [vmem:[%s2352_s2 + $0x30] sm:$0xff]  }
   0x6   :  { %v1729_v16 = vld [vmem:[%s2352_s2 + $0x38] sm:$0xff]   ;;  %v1730_v17 = vld [vmem:[%s2352_s2 + $0x40] sm:$0xff]   ;;  %v1731_v18 = vld [vmem:[%s2352_s2 + $0x48] sm:$0xff]  }
   0x7   :  { %241 = vmatpush1.bf16.msra.mxu0 %v1715_v4  ;;  %v1732_v19 = vld [vmem:[%s2352_s2 + $0x50] sm:$0xff]   ;;  %v1733_v20 = vld [vmem:[%s2352_s2 + $0x58] sm:$0xff]   ;;  %v1734_v21 = vld [vmem:[%s2352_s2 + $0x60] sm:$0xff]  }
   0x8   :  { %242 = vmatprep.subr.bf16.mxu0 %v1716_v5  ;;  %v1735_v22 = vld [vmem:[%s2352_s2 + $0x68] sm:$0xff]   ;;  %v1736_v23 = vld [vmem:[%s2352_s2 + $0x70] sm:$0xff]   ;;  %v1737_v24 = vld [vmem:[%s2352_s2 + $0x78] sm:$0xff]  }
   0x9   :  { %v1740_v44 = vld [vmem:[%s2353_s0 + $0x4] ss:$8 sps:$4 sm:$0xff]   ;;  %v1743_v46 = vld [vmem:[%s2353_s0 + $0x14] ss:$8 sps:$4 sm:$0xff]  }
   0xa   :  { %710 = vmatprep.mubr.bf16.mxu1 %v1743_v46 }
   0xb   :  { %243 = vmatpush1.bf16.msra.mxu0 %v1718_v6 }
   0xc   :  { %244 = vmatprep.subr.bf16.mxu0 %v1719_v7 }
   0xf   :  { %245 = vmatpush1.bf16.msra.mxu0 %v1721_v8 }
  0x12   :  { %1371 = vmatmul.mubr.msk.bf16.vlgmr.msra.gmra.mxu0 %vm181_vm0, %v1722_v9 }
  0x13   :  { %272 = vmatprep.mubr.bf16.mxu0 %v1786_v1 }
  0x1a   :  { %1372 = vmatmul.mubr.msk.bf16.gmra.mxu0 %vm181_vm0, %v1723_v10 }
  0x1b   :  { %282 = vmatprep.mubr.bf16.mxu0 %v1786_v1 }
  0x22   :  { %1373 = vmatmul.mubr.msk.bf16.gmra.mxu0 %vm181_vm0, %v1724_v11 }
  0x23   :  { %292 = vmatprep.mubr.bf16.mxu0 %v1786_v1 }
  0x2a   :  { %1374 = vmatmul.mubr.msk.bf16.gmra.mxu0 %vm181_vm0, %v1725_v12 }
  0x2b   :  { %302 = vmatprep.mubr.bf16.mxu0 %v1786_v1 }
  0x32   :  { %1375 = vmatmul.mubr.msk.bf16.gmra.mxu0 %vm181_vm0, %v1726_v13 }
  0x33   :  { %312 = vmatprep.mubr.bf16.mxu0 %v1786_v1 }
  0x3a   :  { %1376 = vmatmul.mubr.msk.bf16.gmra.mxu0 %vm181_vm0, %v1727_v14 }
  0x3b   :  { %322 = vmatprep.mubr.bf16.mxu0 %v1786_v1 }
  0x42   :  { %1377 = vmatmul.mubr.msk.bf16.gmra.mxu0 %vm181_vm0, %v1728_v15 }
  0x43   :  { %332 = vmatprep.mubr.bf16.mxu0 %v1786_v1 }
  0x4a   :  { %1378 = vmatmul.mubr.msk.bf16.gmra.mxu0 %vm181_vm0, %v1729_v16 }
  0x4b   :  { %342 = vmatprep.mubr.bf16.mxu0 %v1786_v1 }
  0x52   :  { %1379 = vmatmul.mubr.msk.bf16.gmra.mxu0 %vm181_vm0, %v1730_v17 }
  0x53   :  { %352 = vmatprep.mubr.bf16.mxu0 %v1786_v1 }
  0x5a   :  { %1380 = vmatmul.mubr.msk.bf16.gmra.mxu0 %vm181_vm0, %v1731_v18 }
  0x5b   :  { %362 = vmatprep.mubr.bf16.mxu0 %v1786_v1 }
  0x62   :  { %1381 = vmatmul.mubr.msk.bf16.gmra.mxu0 %vm181_vm0, %v1732_v19 }
  0x63   :  { %372 = vmatprep.mubr.bf16.mxu0 %v1786_v1 }
  0x6a   :  { %1382 = vmatmul.mubr.msk.bf16.gmra.mxu0 %vm181_vm0, %v1733_v20 }
  0x6b   :  { %382 = vmatprep.mubr.bf16.mxu0 %v1786_v1 }
  0x72   :  { %1383 = vmatmul.mubr.msk.bf16.gmra.mxu0 %vm181_vm0, %v1734_v21 }
  0x73   :  { %392 = vmatprep.mubr.bf16.mxu0 %v1786_v1 }
  0x7a   :  { %1384 = vmatmul.mubr.msk.bf16.gmra.mxu0 %vm181_vm0, %v1735_v22  ;;  %v833_v22 = vld [vmem:[%s2354_s1 + $0x10] sm:$0xff] }
  0x7b   :  { %402 = vmatprep.mubr.bf16.mxu0 %v1786_v1  ;;  %875 = vperm.xlu1 %1709, %v833_v22   ;;  %v843_v22 = vld [vmem:[%s2354_s1 + $0x60] sm:$0xff] }
  0x82   :  { %1385 = vmatmul.mubr.msk.bf16.gmra.mxu0 %vm181_vm0, %v1736_v23  ;;  %v831_v23 = vld [vmem:[%s2354_s1] sm:$0xff] }
  0x83   :  { %412 = vmatprep.mubr.bf16.mxu0 %v1786_v1  ;;  %865 = vperm.xlu0 %1708, %v831_v23  }
  0x8a   :  { %1386 = vmatmul.mubr.msk.bf16.gmra.mxu0 %vm181_vm0, %v1737_v24 }
  0x8b   :  { %702 = vmatprep.mubr.bf16.mxu0 %v1740_v44 }
  0xd2   :  { %v264_v25 = vpop.f32.mrf.mxu0 }
  0xd4   :  { %v1923_v26 = vpop.f32.mrf.mxu0 }
  0xd6   :  { %v268_v27 = vpop.f32.mrf.mxu0 }
  0xd7   :  { %v1925_v28 = vpack.c.bf16 %v268_v27, %v264_v25 }
  0xd8   :  { %v1927_v29 = vpop.f32.mrf.mxu0 }
  0xda   :  { %v274_v30 = vpop.f32.mrf.mxu0 }
  0xdc   :  { %v1929_v31 = vpop.f32.mrf.mxu0 }
  0xde   :  { %v278_v32 = vpop.f32.mrf.mxu0 }
  0xdf   :  { %v1931_v33 = vpack.c.bf16 %v278_v32, %v274_v30  ;;  %v834_v30 = vld [vmem:[%s2354_s1 + $0x18] sm:$0xff]  ;;  %v832_v32 = vld [vmem:[%s2354_s1 + $0x8] sm:$0xff] }
  0xe0   :  { %v1933_v34 = vpop.f32.mrf.mxu0  ;;  %880 = vperm.xlu1 %1709, %v834_v30   ;;  %870 = vperm.xlu0 %1708, %v832_v32  }
  0xe2   :  { %v284_v35 = vpop.f32.mrf.mxu0 }
  0xe4   :  { %v1935_v36 = vpop.f32.mrf.mxu0 }
  0xe6   :  { %v288_v37 = vpop.f32.mrf.mxu0 }
  0xe7   :  { %v1937_v38 = vpack.c.bf16 %v288_v37, %v284_v35  ;;  %v836_v37 = vld [vmem:[%s2354_s1 + $0x28] sm:$0xff] }
  0xe8   :  { %v1939_v39 = vpop.f32.mrf.mxu0  ;;  %890 = vperm.xlu1 %1709, %v836_v37  }
  0xea   :  { %v294_v40 = vpop.f32.mrf.mxu0 }
  0xec   :  { %v1941_v41 = vpop.f32.mrf.mxu0 }
  0xee   :  { %v298_v42 = vpop.f32.mrf.mxu0 }
  0xef   :  { %v1943_v43 = vpack.c.bf16 %v298_v42, %v294_v40  ;;  %v835_v40 = vld [vmem:[%s2354_s1 + $0x20] sm:$0xff] }
  0xf0   :  { %v1948_v45 = vpop.f32.mrf.mxu0  ;;  %885 = vperm.xlu0 %1708, %v835_v40   ;;  %v846_v40 = vld [vmem:[%s2354_s1 + $0x78] sm:$0xff] }
  0xf2   :  { %v304_v47 = vpop.f32.mrf.mxu0 }
  0xf4   :  { %v1953_v48 = vpop.f32.mrf.mxu0 }
  0xf6   :  { %v308_v49 = vpop.f32.mrf.mxu0 }
  0xf7   :  { %v1955_v50 = vpack.c.bf16 %v308_v49, %v304_v47  ;;  %v838_v47 = vld [vmem:[%s2354_s1 + $0x38] sm:$0xff]  ;;  %v837_v49 = vld [vmem:[%s2354_s1 + $0x30] sm:$0xff] }
  0xf8   :  { %v1957_v51 = vpop.f32.mrf.mxu0  ;;  %900 = vperm.xlu1 %1709, %v838_v47   ;;  %895 = vperm.xlu0 %1708, %v837_v49   ;;  %v845_v47 = vld [vmem:[%s2354_s1 + $0x70] sm:$0xff] }
  0xfa   :  { %v314_v52 = vpop.f32.mrf.mxu0 }
  0xfc   :  { %v1959_v53 = vpop.f32.mrf.mxu0 }
  0xfe   :  { %v318_v54 = vpop.f32.mrf.mxu0 }
  0xff   :  { %v1961_v55 = vpack.c.bf16 %v318_v54, %v314_v52  ;;  %v840_v54 = vld [vmem:[%s2354_s1 + $0x48] sm:$0xff] }
 0x100   :  { %v1963_v56 = vpop.f32.mrf.mxu0  ;;  %910 = vperm.xlu1 %1709, %v840_v54   ;;  %v847_v54 = vld [vmem:[%s2354_s1 + $0x80] sm:$0xff] }
 0x102   :  { %v324_v57 = vpop.f32.mrf.mxu0 }
 0x104   :  { %v1965_v58 = vpop.f32.mrf.mxu0 }
 0x106   :  { %v328_v59 = vpop.f32.mrf.mxu0 }
 0x107   :  { %v1967_v60 = vpack.c.bf16 %v328_v59, %v324_v57  ;;  %v839_v57 = vld [vmem:[%s2354_s1 + $0x40] sm:$0xff] }
 0x108   :  { %v1969_v61 = vpop.f32.mrf.mxu0  ;;  %905 = vperm.xlu0 %1708, %v839_v57   ;;  %v860_v57 = vld [vmem:[%s2354_s1 + $0xe8] sm:$0xff] }
 0x10a   :  { %v334_v62 = vpop.f32.mrf.mxu0 }
 0x10c   :  { %v1971_v63 = vpop.f32.mrf.mxu0 }
 0x10e   :  { %v338_v0 = vpop.f32.mrf.mxu0 }
 0x10f   :  { %v1973_v1 = vpack.c.bf16 %v338_v0, %v334_v62 }
 0x110   :  { %v1975_v2 = vpop.f32.mrf.mxu0 }
 0x112   :  { %v344_v3 = vpop.f32.mrf.mxu0 }
 0x114   :  { %v1977_v4 = vpop.f32.mrf.mxu0 }
 0x116   :  { %v348_v5 = vpop.f32.mrf.mxu0 }
 0x117   :  { %v1979_v6 = vpack.c.bf16 %v348_v5, %v344_v3  ;;  %v842_v3 = vld [vmem:[%s2354_s1 + $0x58] sm:$0xff]  ;;  %v841_v5 = vld [vmem:[%s2354_s1 + $0x50] sm:$0xff] }
 0x118   :  { %v1981_v7 = vpop.f32.mrf.mxu0  ;;  %920 = vperm.xlu1 %1709, %v842_v3   ;;  %915 = vperm.xlu0 %1708, %v841_v5   ;;  %v861_v3 = vld [vmem:[%s2354_s1 + $0xf0] sm:$0xff] }
 0x119   :  { %v1747_v5 = vld [vmem:[%s2353_s0 + $0x34] ss:$8 sps:$4 sm:$0xff]  }
 0x11a   :  { %v354_v8 = vpop.f32.mrf.mxu0 }
 0x11c   :  { %v1983_v9 = vpop.f32.mrf.mxu0  ;;  %925 = vperm.xlu0 %1708, %v843_v22   ;;  %v1752_v22 = vld [vmem:[%s2353_s0 + $0x40] ss:$8 sps:$4 sm:$0xff]  }
 0x11e   :  { %v358_v10 = vpop.f32.mrf.mxu0 }
 0x11f   :  { %v1985_v11 = vpack.c.bf16 %v358_v10, %v354_v8  ;;  %v844_v10 = vld [vmem:[%s2354_s1 + $0x68] sm:$0xff] }
 0x120   :  { %v1987_v12 = vpop.f32.mrf.mxu0  ;;  %930 = vperm.xlu1 %1709, %v844_v10   ;;  %935 = vperm.xlu0 %1708, %v845_v47   ;;  %v1750_v10 = vld [vmem:[%s2353_s0 + $0x44] ss:$8 sps:$4 sm:$0xff]   ;;  %v1759_v47 = vld [vmem:[%s2353_s0 + $0x74] ss:$8 sps:$4 sm:$0xff]  }
 0x122   :  { %v1989_v13 = vpop.f32.mrf.mxu0 }
 0x124   :  { %v1991_v14 = vpop.f32.mrf.mxu0  ;;  %940 = vperm.xlu1 %1709, %v846_v40   ;;  %945 = vperm.xlu0 %1708, %v847_v54   ;;  %v1758_v40 = vld [vmem:[%s2353_s0 + $0x60] ss:$8 sps:$4 sm:$0xff]  }
 0x125   :  { %v1764_v54 = vld [vmem:[%s2353_s0 + $0x80] ss:$8 sps:$4 sm:$0xff]  }
 0x126   :  { %v1993_v15 = vpop.f32.mrf.mxu0 }
 0x128   :  { %v1995_v16 = vpop.f32.mrf.mxu0 }
 0x12a   :  { %v1997_v17 = vpop.f32.mrf.mxu0 }
 0x12c   :  { %v1999_v18 = vpop.f32.mrf.mxu0 }
 0x12e   :  { %v2001_v19 = vpop.f32.mrf.mxu0 }
 0x130   :  { %v2003_v20 = vpop.f32.mrf.mxu0 }
 0x132   :  { %v2005_v21 = vpop.f32.mrf.mxu0 }
 0x134   :  { %v2013_v24 = vpop.f32.mrf.mxu0 }
 0x136   :  { %v388_v25 = vpop.f32.mrf.mxu0 }
 0x138   :  { %v2015_v27 = vpop.f32.mrf.mxu0 }
 0x13a   :  { %v394_v35 = vpop.f32.mrf.mxu0 }
 0x13c   :  { %v2029_v42 = vpop.f32.mrf.mxu0 }
 0x13e   :  { %v398_v44 = vpop.f32.mrf.mxu0 }
 0x13f   :  { %v436_v49 = vpack.c.bf16 %v398_v44, %v394_v35  ;;  %v850_v35 = vld [vmem:[%s2354_s1 + $0x98] sm:$0xff]  ;;  %v849_v44 = vld [vmem:[%s2354_s1 + $0x90] sm:$0xff] }
 0x140   :  { %v2031_v46 = vpop.f32.mrf.mxu0  ;;  %955 = vperm.xlu0 %1708, %v849_v44   ;;  %v1768_v44 = vld [vmem:[%s2353_s0 + $0xa4] ss:$8 sps:$4 sm:$0xff]  }
 0x142   :  { %v404_v52 = vpop.f32.mrf.mxu0 }
 0x144   :  { %v2045_v59 = vpop.f32.mrf.mxu0 }
 0x146   :  { %v408_v62 = vpop.f32.mrf.mxu0 }
 0x147   :  { %v437_v37 = vpack.c.bf16 %v408_v62, %v404_v52  ;;  %v848_v52 = vld [vmem:[%s2354_s1 + $0x88] sm:$0xff]  ;;  %v862_v62 = vld [vmem:[%s2354_s1 + $0xf8] sm:$0xff] }
 0x148   :  { %v2047_v0 = vpop.f32.mrf.mxu0  ;;  %950 = vperm.xlu1 %1709, %v848_v52   ;;  %v1762_v52 = vld [vmem:[%s2353_s0 + $0x84] ss:$8 sps:$4 sm:$0xff]  }
 0x14a   :  { %v414_v8 = vpop.f32.mrf.mxu0 }
 0x14c   :  { %v2061_v23 = vpop.f32.mrf.mxu0  ;;  %960 = vperm.xlu1 %1709, %v850_v35   ;;  %v1767_v35 = vld [vmem:[%s2353_s0 + $0x90] ss:$8 sps:$4 sm:$0xff]  }
 0x14e   :  { %v418_v30 = vpop.f32.mrf.mxu0 }
 0x14f   :  { %v438_v32 = vpack.c.bf16 %v418_v30, %v414_v8  ;;  %v1749_v8 = vld [vmem:[%s2353_s0 + $0x30] ss:$8 sps:$4 sm:$0xff]   ;;  %v1753_v30 = vld [vmem:[%s2353_s0 + $0x54] ss:$8 sps:$4 sm:$0xff]  }
 0x151   :  { %1579 = vmatprep.subr.bf16.mxu0 %v438_v32  ;;  %1691 = vmatprep.subr.bf16.mxu1 %v438_v32  ;;  %v1755_v32 = vld [vmem:[%s2353_s0 + $0x50] ss:$8 sps:$4 sm:$0xff]  }
 0x152   :  { %1580 = vmatpush3.bf16.msra.mxu0 %v1973_v1  ;;  %1699 = vmatpush3.bf16.msra.mxu1 %v1973_v1  ;;  %v435_v1 = vpack.c.bf16 %v388_v25, %v2005_v21  ;;  %v852_v21 = vld [vmem:[%s2354_s1 + $0xa8] sm:$0xff]  ;;  %v851_v25 = vld [vmem:[%s2354_s1 + $0xa0] sm:$0xff] }
 0x153   :  { %1581 = vmatprep.subr.bf16.mxu0 %v437_v37  ;;  %1692 = vmatprep.subr.bf16.mxu1 %v437_v37  ;;  %v1756_v37 = vld [vmem:[%s2353_s0 + $0x64] ss:$8 sps:$4 sm:$0xff]  }
 0x154   :  { %970 = vperm.xlu1 %1709, %v852_v21   ;;  %965 = vperm.xlu0 %1708, %v851_v25   ;;  %v1771_v21 = vld [vmem:[%s2353_s0 + $0xb4] ss:$8 sps:$4 sm:$0xff]   ;;  %v1773_v25 = vld [vmem:[%s2353_s0 + $0xb0] ss:$8 sps:$4 sm:$0xff]  }
 0x156   :  { %1582 = vmatpush3.bf16.msra.mxu0 %v1967_v60  ;;  %1700 = vmatpush3.bf16.msra.mxu1 %v1967_v60  ;;  %v434_v60 = vpack.c.bf16 %v2001_v19, %v1997_v17  ;;  %v854_v17 = vld [vmem:[%s2354_s1 + $0xb8] sm:$0xff]  ;;  %v853_v19 = vld [vmem:[%s2354_s1 + $0xb0] sm:$0xff] }
 0x157   :  { %1583 = vmatprep.subr.bf16.mxu0 %v436_v49  ;;  %1693 = vmatprep.subr.bf16.mxu1 %v436_v49  ;;  %v1761_v49 = vld [vmem:[%s2353_s0 + $0x70] ss:$8 sps:$4 sm:$0xff]  }
 0x158   :  { %980 = vperm.xlu1 %1709, %v854_v17   ;;  %975 = vperm.xlu0 %1708, %v853_v19   ;;  %v1776_v17 = vld [vmem:[%s2353_s0 + $0xc0] ss:$8 sps:$4 sm:$0xff]   ;;  %v1777_v19 = vld [vmem:[%s2353_s0 + $0xd4] ss:$8 sps:$4 sm:$0xff]  }
 0x15a   :  { %1584 = vmatpush3.bf16.msra.mxu0 %v1961_v55  ;;  %1701 = vmatpush3.bf16.msra.mxu1 %v1961_v55  ;;  %v433_v55 = vpack.c.bf16 %v1993_v15, %v1989_v13  ;;  %v855_v13 = vld [vmem:[%s2354_s1 + $0xc0] sm:$0xff]  ;;  %v857_v15 = vld [vmem:[%s2354_s1 + $0xd0] sm:$0xff] }
 0x15b   :  { %1585 = vmatprep.subr.bf16.mxu0 %v435_v1  ;;  %1694 = vmatprep.subr.bf16.mxu1 %v435_v1  ;;  %v1765_v1 = vld [vmem:[%s2353_s0 + $0x94] ss:$8 sps:$4 sm:$0xff]  }
 0x15c   :  { %985 = vperm.xlu0 %1708, %v855_v13   ;;  %v1780_v13 = vld [vmem:[%s2353_s0 + $0xe4] ss:$8 sps:$4 sm:$0xff]  }
 0x15e   :  { %1586 = vmatpush3.bf16.msra.mxu0 %v1955_v50  ;;  %1702 = vmatpush3.bf16.msra.mxu1 %v1955_v50  ;;  %v856_v50 = vld [vmem:[%s2354_s1 + $0xc8] sm:$0xff] }
 0x15f   :  { %1587 = vmatprep.subr.bf16.mxu0 %v434_v60  ;;  %1695 = vmatprep.subr.bf16.mxu1 %v434_v60  ;;  %v1770_v60 = vld [vmem:[%s2353_s0 + $0xa0] ss:$8 sps:$4 sm:$0xff]  }
 0x160   :  { %990 = vperm.xlu1 %1709, %v856_v50   ;;  %995 = vperm.xlu0 %1708, %v857_v15   ;;  %v1779_v50 = vld [vmem:[%s2353_s0 + $0xd0] ss:$8 sps:$4 sm:$0xff]   ;;  %v1783_v15 = vld [vmem:[%s2353_s0 + $0xf4] ss:$8 sps:$4 sm:$0xff]  }
 0x162   :  { %1588 = vmatpush3.bf16.msra.mxu0 %v1943_v43  ;;  %1703 = vmatpush3.bf16.msra.mxu1 %v1943_v43  ;;  %v858_v43 = vld [vmem:[%s2354_s1 + $0xd8] sm:$0xff] }
 0x163   :  { %1589 = vmatprep.subr.bf16.mxu0 %v433_v55  ;;  %1696 = vmatprep.subr.bf16.mxu1 %v433_v55  ;;  %v1774_v55 = vld [vmem:[%s2353_s0 + $0xc4] ss:$8 sps:$4 sm:$0xff]  }
 0x164   :  { %1000 = vperm.xlu1 %1709, %v858_v43   ;;  %v1782_v43 = vld [vmem:[%s2353_s0 + $0xe0] ss:$8 sps:$4 sm:$0xff]  }
 0x166   :  { %1590 = vmatpush3.bf16.msra.mxu0 %v1937_v38  ;;  %1704 = vmatpush3.bf16.msra.mxu1 %v1937_v38  ;;  %v1738_v38 = vld [vmem:[%s2353_s0] ss:$8 sps:$4 sm:$0xff]  }
 0x167   :  { %1591 = vmatprep.subr.bf16.mxu0 %v1985_v11  ;;  %1697 = vmatprep.subr.bf16.mxu1 %v1985_v11  ;;  %v1741_v11 = vld [vmem:[%s2353_s0 + $0x10] ss:$8 sps:$4 sm:$0xff]  }
 0x168   :  { %1010 = vperm.xlu1 %1709, %v860_v57   ;;  %v866_v57 = vpop.permute.xlu0 %865 }
 0x16a   :  { %1592 = vmatpush3.bf16.msra.mxu0 %v1931_v33  ;;  %1705 = vmatpush3.bf16.msra.mxu1 %v1931_v33  ;;  %v859_v33 = vld [vmem:[%s2354_s1 + $0xe0] sm:$0xff] }
 0x16b   :  { %1593 = vmatprep.subr.bf16.mxu0 %v1979_v6  ;;  %1698 = vmatprep.subr.bf16.mxu1 %v1979_v6  ;;  %v1744_v6 = vld [vmem:[%s2353_s0 + $0x24] ss:$8 sps:$4 sm:$0xff]  }
 0x16c   :  { %1005 = vperm.xlu0 %1708, %v859_v33   ;;  %1020 = vperm.xlu1 %1709, %v862_v62   ;;  %v2237_v62 = vld [vmem:[%s2355_s4] ss:$0 sm:$0xff] }
 0x16e   :  { %1594 = vmatpush3.bf16.msra.mxu0 %v1925_v28  ;;  %1706 = vmatpush3.bf16.msra.mxu1 %v1925_v28  ;;  %v1746_v28 = vld [vmem:[%s2353_s0 + $0x20] ss:$8 sps:$4 sm:$0xff]  }
 0x170   :  { %1015 = vperm.xlu0 %1708, %v861_v3  }
 0x171   :  { %703 = vmatmul.mubr.bf16.vlgmr.msra.gmra.mxu0 %v1738_v38  ;;  %711 = vmatmul.mubr.bf16.vlgmr.msra.gmra.mxu1 %v1741_v11  ;;  %v1785_v38 = vld [vmem:[%s2353_s0 + $0xf0] ss:$8 sps:$4 sm:$0xff]   ;;  %v2232_v11 = vpop.f32.mrf.mxu0 }
 0x172   :  { %718 = vmatprep.mubr.bf16.mxu1 %v1744_v6 }
 0x179   :  { %719 = vmatmul.mubr.bf16.gmra.mxu1 %v1746_v28 }
 0x17a   :  { %726 = vmatprep.mubr.bf16.mxu1 %v1747_v5  ;;  %v876_v5 = vpop.permute.xlu1 %875 }
 0x181   :  { %727 = vmatmul.mubr.bf16.gmra.mxu1 %v1749_v8 }
 0x182   :  { %734 = vmatprep.mubr.bf16.mxu1 %v1750_v10 }
 0x189   :  { %735 = vmatmul.mubr.bf16.gmra.mxu1 %v1752_v22 }
 0x18a   :  { %742 = vmatprep.mubr.bf16.mxu1 %v1753_v30 }
 0x191   :  { %743 = vmatmul.mubr.bf16.gmra.mxu1 %v1755_v32  ;;  %v446_v32 = vadd.f32 %v2237_v62, %v1923_v26  ;;  %v449_v26 = vadd.f32 %v2237_v62, %v1933_v34 }
 0x192   :  { %750 = vmatprep.mubr.bf16.mxu1 %v1756_v37 }
 0x199   :  { %751 = vmatmul.mubr.bf16.gmra.mxu1 %v1758_v40 }
 0x19a   :  { %758 = vmatprep.mubr.bf16.mxu1 %v1759_v47  ;;  %v871_v47 = vpop.permute.xlu0 %870 }
 0x1a1   :  { %759 = vmatmul.mubr.bf16.gmra.mxu1 %v1761_v49  ;;  %v448_v49 = vadd.f32 %v2237_v62, %v1929_v31 }
 0x1a2   :  { %766 = vmatprep.mubr.bf16.mxu1 %v1762_v52 }
 0x1a9   :  { %767 = vmatmul.mubr.bf16.gmra.mxu1 %v1764_v54 }
 0x1aa   :  { %774 = vmatprep.mubr.bf16.mxu1 %v1765_v1 }
 0x1b1   :  { %775 = vmatmul.mubr.bf16.gmra.mxu1 %v1767_v35 }
 0x1b2   :  { %782 = vmatprep.mubr.bf16.mxu1 %v1768_v44 }
 0x1b9   :  { %783 = vmatmul.mubr.bf16.gmra.mxu1 %v1770_v60 }
 0x1ba   :  { %790 = vmatprep.mubr.bf16.mxu1 %v1771_v21 }
 0x1c1   :  { %791 = vmatmul.mubr.bf16.gmra.mxu1 %v1773_v25  ;;  %v881_v25 = vpop.permute.xlu1 %880 }
 0x1c2   :  { %798 = vmatprep.mubr.bf16.mxu1 %v1774_v55  ;;  %v447_v55 = vadd.f32 %v2237_v62, %v1927_v29 }
 0x1c9   :  { %799 = vmatmul.mubr.bf16.gmra.mxu1 %v1776_v17 }
 0x1ca   :  { %806 = vmatprep.mubr.bf16.mxu1 %v1777_v19 }
 0x1d1   :  { %807 = vmatmul.mubr.bf16.gmra.mxu1 %v1779_v50 }
 0x1d2   :  { %814 = vmatprep.mubr.bf16.mxu1 %v1780_v13 }
 0x1d9   :  { %815 = vmatmul.mubr.bf16.gmra.mxu1 %v1782_v43 }
 0x1da   :  { %822 = vmatprep.mubr.bf16.mxu1 %v1783_v15 }
 0x1e1   :  { %823 = vmatmul.mubr.bf16.gmra.mxu1 %v1785_v38 }
 0x231   :  { %v1595_v33 = vpop.f32.mrf.mxu0  ;;  %v1601_v6 = vpop.f32.mrf.mxu1 }
 0x233   :  { %v1596_v3 = vpop.f32.mrf.mxu0  ;;  %v1602_v28 = vpop.f32.mrf.mxu1 }
 0x234   :  { %v1597_v8 = vadd.f32 %v1596_v3, %v1595_v33  ;;  %v1603_v10 = vadd.f32 %v1602_v28, %v1601_v6  ;;  %v450_v6 = vadd.f32 %v2237_v62, %v1935_v36  ;;  %v451_v36 = vadd.f32 %v2237_v62, %v1939_v39 }
 0x235   :  { %v1598_v22 = vpop.f32.mrf.mxu0  ;;  %v1604_v30 = vpop.f32.mrf.mxu1 }
 0x236   :  { %v1023_v37 = vmul.f32 %v1597_v8, %v866_v57  ;;  %v1025_v40 = vmul.f32 %v1603_v10, %v876_v5  ;;  %v886_v57 = vpop.permute.xlu0 %885 }
 0x237   :  { %v1599_v52 = vpop.f32.mrf.mxu0  ;;  %v1605_v54 = vpop.f32.mrf.mxu1 }
 0x238   :  { %v1055_v1 = vadd.f32 %v1023_v37, %v446_v32  ;;  %v1600_v35 = vadd.f32 %v1599_v52, %v1598_v22  ;;  %v1606_v44 = vadd.f32 %v1605_v54, %v1604_v30  ;;  %v1057_v60 = vadd.f32 %v1025_v40, %v448_v49  ;;  %v891_v49 = vpop.permute.xlu1 %890 }
 0x239   :  { %v1607_v21 = vpop.f32.mrf.mxu1 }
 0x23a   :  { %v1024_v17 = vmul.f32 %v1600_v35, %v871_v47  ;;  %v1026_v19 = vmul.f32 %v1606_v44, %v881_v25  ;;  %v1119_v13 = vmul.f32 0.01, %v1055_v1  ;;  %vm1087_vm1 = vcmp.gt.f32.partialorder %v1055_v1, 0.0  ;;  %v896_v44 = vpop.permute.xlu0 %895 }
 0x23b   :  { %v1608_v50 = vpop.f32.mrf.mxu1  ;;  %v1121_v31 = vmul.f32 0.01, %v1057_v60  ;;  %vm1089_vm2 = vcmp.gt.f32.partialorder %v1057_v60, 0.0  ;;  %v452_v25 = vadd.f32 %v2237_v62, %v1941_v41 }
 0x23c   :  { %v1609_v43 = vadd.f32 %v1608_v50, %v1607_v21  ;;  %v1056_v15 = vadd.f32 %v1024_v17, %v447_v55  ;;  %v1058_v38 = vadd.f32 %v1026_v19, %v449_v26  ;;  %v1151_v5 = vsel %vm1087_vm1, %v1055_v1, %v1119_v13  ;;  %v901_v13 = vpop.permute.xlu1 %900 }
 0x23d   :  { %v1610_v33 = vpop.f32.mrf.mxu1  ;;  %v1153_v10 = vsel %vm1089_vm2, %v1057_v60, %v1121_v31 }
 0x23e   :  { %v1027_v3 = vmul.f32 %v1609_v43, %v886_v57  ;;  %vm1088_vm3 = vcmp.gt.f32.partialorder %v1056_v15, 0.0  ;;  %v1120_v29 = vmul.f32 0.01, %v1056_v15  ;;  %vm1090_vm4 = vcmp.gt.f32.partialorder %v1058_v38, 0.0 }
 0x23f   :  { %v1122_v34 = vmul.f32 0.01, %v1058_v38  ;;  %v1611_v28 = vpop.f32.mrf.mxu1 }
 0x240   :  { %v1612_v8 = vadd.f32 %v1611_v28, %v1610_v33  ;;  %v1152_v22 = vsel %vm1088_vm3, %v1056_v15, %v1120_v29  ;;  %v1059_v32 = vadd.f32 %v1027_v3, %v450_v6  ;;  %v453_v15 = vadd.f32 %v2237_v62, %v1948_v45  ;;  %v906_v29 = vpop.permute.xlu0 %905 }
 0x241   :  { %v1154_v30 = vsel %vm1090_vm4, %v1058_v38, %v1122_v34  ;;  %v1613_v37 = vpop.f32.mrf.mxu1  ;;  %v1487_v40 = vpack.c.bf16 %v1152_v22, %v1151_v5  ;;  %v454_v28 = vadd.f32 %v2237_v62, %v1953_v48 }
 0x242   :  { %v1492_v47 = vpack.c.bf16 %v1154_v30, %v1153_v10  ;;  %v1028_v52 = vmul.f32 %v1612_v8, %v891_v49  ;;  %v1123_v35 = vmul.f32 0.01, %v1059_v32  ;;  %vm1091_vm5 = vcmp.gt.f32.partialorder %v1059_v32, 0.0 }
 0x243   :  { %v1614_v54 = vpop.f32.mrf.mxu1  ;;  %1488 = vst [vmem:[%s2356_s5] sm:$0xff] %v1487_v40   ;;  %v455_v49 = vadd.f32 %v2237_v62, %v1957_v51 }
 0x244   :  { %1564 = vst [vmem:[%s2356_s5 + $0x8] sm:$0xff] %v1492_v47   ;;  %v1615_v1 = vadd.f32 %v1614_v54, %v1613_v37  ;;  %v1060_v60 = vadd.f32 %v1028_v52, %v451_v36  ;;  %v1155_v50 = vsel %vm1091_vm5, %v1059_v32, %v1123_v35  ;;  %v911_v37 = vpop.permute.xlu1 %910  ;;  %v916_v35 = vpop.permute.xlu0 %915 }
 0x245   :  { %v1616_v21 = vpop.f32.mrf.mxu1 }
 0x246   :  { %v1029_v39 = vmul.f32 %v1615_v1, %v896_v44  ;;  %vm1092_vm6 = vcmp.gt.f32.partialorder %v1060_v60, 0.0  ;;  %v1124_v55 = vmul.f32 0.01, %v1060_v60 }
 0x247   :  { %v1617_v26 = vpop.f32.mrf.mxu1 }
 0x248   :  { %v1061_v17 = vadd.f32 %v1029_v39, %v452_v25  ;;  %v1618_v19 = vadd.f32 %v1617_v26, %v1616_v21  ;;  %v1156_v43 = vsel %vm1092_vm6, %v1060_v60, %v1124_v55  ;;  %v456_v60 = vadd.f32 %v2237_v62, %v1959_v53 }
 0x249   :  { %v1619_v31 = vpop.f32.mrf.mxu1  ;;  %v1497_v38 = vpack.c.bf16 %v1156_v43, %v1155_v50  ;;  %v457_v43 = vadd.f32 %v2237_v62, %v1963_v56 }
 0x24a   :  { %v1030_v57 = vmul.f32 %v1618_v19, %v901_v13  ;;  %v1125_v41 = vmul.f32 0.01, %v1061_v17  ;;  %vm1093_vm7 = vcmp.gt.f32.partialorder %v1061_v17, 0.0  ;;  %v921_v19 = vpop.permute.xlu1 %920 }
 0x24b   :  { %v1620_v33 = vpop.f32.mrf.mxu1  ;;  %1565 = vst [vmem:[%s2356_s5 + $0x10] sm:$0xff] %v1497_v38  }
 0x24c   :  { %v1062_v6 = vadd.f32 %v1030_v57, %v453_v15  ;;  %v1621_v3 = vadd.f32 %v1620_v33, %v1619_v31  ;;  %v1157_v10 = vsel %vm1093_vm7, %v1061_v17, %v1125_v41  ;;  %v926_v33 = vpop.permute.xlu0 %925 }
 0x24d   :  { %v1622_v34 = vpop.f32.mrf.mxu1 }
 0x24e   :  { %vm1094_vm8 = vcmp.gt.f32.partialorder %v1062_v6, 0.0  ;;  %v1126_v5 = vmul.f32 0.01, %v1062_v6  ;;  %v1031_v8 = vmul.f32 %v1621_v3, %v906_v29 }
 0x24f   :  { %v1623_v45 = vpop.f32.mrf.mxu1 }
 0x250   :  { %v1158_v22 = vsel %vm1094_vm8, %v1062_v6, %v1126_v5  ;;  %v1063_v30 = vadd.f32 %v1031_v8, %v454_v28  ;;  %v1624_v32 = vadd.f32 %v1623_v45, %v1622_v34  ;;  %v458_v6 = vadd.f32 %v2237_v62, %v1965_v58  ;;  %v931_v45 = vpop.permute.xlu1 %930 }
 0x251   :  { %v1502_v40 = vpack.c.bf16 %v1158_v22, %v1157_v10  ;;  %v1625_v47 = vpop.f32.mrf.mxu1 }
 0x252   :  { %v1032_v36 = vmul.f32 %v1624_v32, %v911_v37  ;;  %v1127_v52 = vmul.f32 0.01, %v1063_v30  ;;  %vm1095_vm9 = vcmp.gt.f32.partialorder %v1063_v30, 0.0 }
 0x253   :  { %1566 = vst [vmem:[%s2356_s5 + $0x18] sm:$0xff] %v1502_v40   ;;  %v1626_v48 = vpop.f32.mrf.mxu1 }
 0x254   :  { %v1064_v54 = vadd.f32 %v1032_v36, %v455_v49  ;;  %v1627_v1 = vadd.f32 %v1626_v48, %v1625_v47  ;;  %v1159_v51 = vsel %vm1095_vm9, %v1063_v30, %v1127_v52  ;;  %v459_v30 = vadd.f32 %v2237_v62, %v1969_v61  ;;  %v936_v49 = vpop.permute.xlu0 %935 }
 0x255   :  { %v1628_v44 = vpop.f32.mrf.mxu1  ;;  %v460_v48 = vadd.f32 %v2237_v62, %v1971_v63 }
 0x256   :  { %vm1096_vm10 = vcmp.gt.f32.partialorder %v1064_v54, 0.0  ;;  %v1128_v21 = vmul.f32 0.01, %v1064_v54  ;;  %v1033_v25 = vmul.f32 %v1627_v1, %v916_v35 }
 0x257   :  { %v1629_v39 = vpop.f32.mrf.mxu1 }
 0x258   :  { %v1160_v55 = vsel %vm1096_vm10, %v1064_v54, %v1128_v21  ;;  %v1065_v26 = vadd.f32 %v1033_v25, %v456_v60  ;;  %v1630_v17 = vadd.f32 %v1629_v39, %v1628_v44  ;;  %v941_v21 = vpop.permute.xlu1 %940 }
 0x259   :  { %v1507_v50 = vpack.c.bf16 %v1160_v55, %v1159_v51  ;;  %v1631_v13 = vpop.f32.mrf.mxu1  ;;  %v461_v51 = vadd.f32 %v2237_v62, %v1975_v2 }
 0x25a   :  { %v1034_v31 = vmul.f32 %v1630_v17, %v921_v19  ;;  %v1129_v15 = vmul.f32 0.01, %v1065_v26  ;;  %vm1097_vm11 = vcmp.gt.f32.partialorder %v1065_v26, 0.0 }
 0x25b   :  { %1567 = vst [vmem:[%s2356_s5 + $0x20] sm:$0xff] %v1507_v50   ;;  %v1632_v53 = vpop.f32.mrf.mxu1  ;;  %v946_v50 = vpop.permute.xlu0 %945 }
 0x25c   :  { %v1066_v38 = vadd.f32 %v1034_v31, %v457_v43  ;;  %v1633_v57 = vadd.f32 %v1632_v53, %v1631_v13  ;;  %v1161_v56 = vsel %vm1097_vm11, %v1065_v26, %v1129_v15  ;;  %v462_v43 = vadd.f32 %v2237_v62, %v1977_v4 }
 0x25d   :  { %v1634_v41 = vpop.f32.mrf.mxu1 }
 0x25e   :  { %vm1098_vm12 = vcmp.gt.f32.partialorder %v1066_v38, 0.0  ;;  %v1130_v3 = vmul.f32 0.01, %v1066_v38  ;;  %v1035_v29 = vmul.f32 %v1633_v57, %v926_v33 }
 0x25f   :  { %v1635_v34 = vpop.f32.mrf.mxu1 }
 0x260   :  { %v1162_v28 = vsel %vm1098_vm12, %v1066_v38, %v1130_v3  ;;  %v1067_v5 = vadd.f32 %v1035_v29, %v458_v6  ;;  %v1636_v8 = vadd.f32 %v1635_v34, %v1634_v41  ;;  %v951_v41 = vpop.permute.xlu1 %950  ;;  %v463_v29 = vadd.f32 %v2237_v62, %v1981_v7 }
 0x261   :  { %v1512_v10 = vpack.c.bf16 %v1162_v28, %v1161_v56  ;;  %v1637_v22 = vpop.f32.mrf.mxu1 }
 0x262   :  { %v1036_v32 = vmul.f32 %v1636_v8, %v931_v45  ;;  %v1131_v37 = vmul.f32 0.01, %v1067_v5  ;;  %vm1099_vm13 = vcmp.gt.f32.partialorder %v1067_v5, 0.0  ;;  %v956_v8 = vpop.permute.xlu0 %955 }
 0x263   :  { %1568 = vst [vmem:[%s2356_s5 + $0x28] sm:$0xff] %v1512_v10   ;;  %v1638_v58 = vpop.f32.mrf.mxu1  ;;  %v464_v10 = vadd.f32 %v2237_v62, %v1983_v9 }
 0x264   :  { %v1068_v40 = vadd.f32 %v1036_v32, %v459_v30  ;;  %v1639_v47 = vadd.f32 %v1638_v58, %v1637_v22  ;;  %v1163_v61 = vsel %vm1099_vm13, %v1067_v5, %v1131_v37 }
 0x265   :  { %v1640_v36 = vpop.f32.mrf.mxu1 }
 0x266   :  { %vm1100_vm14 = vcmp.gt.f32.partialorder %v1068_v40, 0.0  ;;  %v1132_v52 = vmul.f32 0.01, %v1068_v40  ;;  %v1037_v54 = vmul.f32 %v1639_v47, %v936_v49  ;;  %v961_v47 = vpop.permute.xlu1 %960 }
 0x267   :  { %v1641_v1 = vpop.f32.mrf.mxu1 }
 0x268   :  { %v1164_v35 = vsel %vm1100_vm14, %v1068_v40, %v1132_v52  ;;  %v1069_v44 = vadd.f32 %v1037_v54, %v460_v48  ;;  %v1642_v60 = vadd.f32 %v1641_v1, %v1640_v36  ;;  %v465_v48 = vadd.f32 %v2237_v62, %v1987_v12 }
 0x269   :  { %v1517_v25 = vpack.c.bf16 %v1164_v35, %v1163_v61  ;;  %v1643_v39 = vpop.f32.mrf.mxu1  ;;  %v966_v35 = vpop.permute.xlu0 %965 }
 0x26a   :  { %v1038_v55 = vmul.f32 %v1642_v60, %v941_v21  ;;  %v1133_v26 = vmul.f32 0.01, %v1069_v44  ;;  %vm1101_vm15 = vcmp.gt.f32.partialorder %v1069_v44, 0.0  ;;  %v466_v60 = vadd.f32 %v2237_v62, %v1991_v14 }
 0x26b   :  { %1569 = vst [vmem:[%s2356_s5 + $0x30] sm:$0xff] %v1517_v25   ;;  %v1644_v63 = vpop.f32.mrf.mxu1 }
 0x26c   :  { %v1070_v17 = vadd.f32 %v1038_v55, %v461_v51  ;;  %v1645_v19 = vadd.f32 %v1644_v63, %v1643_v39  ;;  %v1165_v2 = vsel %vm1101_vm15, %v1069_v44, %v1133_v26  ;;  %v971_v26 = vpop.permute.xlu1 %970 }
 0x26d   :  { %v1646_v13 = vpop.f32.mrf.mxu1 }
 0x26e   :  { %vm1102_vm0 = vcmp.gt.f32.partialorder %v1070_v17, 0.0  ;;  %v1134_v31 = vmul.f32 0.01, %v1070_v17  ;;  %v1039_v53 = vmul.f32 %v1645_v19, %v946_v50  ;;  %v467_v50 = vadd.f32 %v2237_v62, %v1995_v16 }
 0x26f   :  { %v1647_v15 = vpop.f32.mrf.mxu1 }
 0x270   :  { %v1166_v38 = vsel %vm1102_vm0, %v1070_v17, %v1134_v31  ;;  %v1071_v57 = vadd.f32 %v1039_v53, %v462_v43  ;;  %v1648_v33 = vadd.f32 %v1647_v15, %v1646_v13  ;;  %v976_v15 = vpop.permute.xlu0 %975 }
 0x271   :  { %v1522_v6 = vpack.c.bf16 %v1166_v38, %v1165_v2  ;;  %v1649_v3 = vpop.f32.mrf.mxu1  ;;  %v468_v38 = vadd.f32 %v2237_v62, %v1999_v18 }
 0x272   :  { %v1040_v34 = vmul.f32 %v1648_v33, %v951_v41  ;;  %v1135_v56 = vmul.f32 0.01, %v1071_v57  ;;  %vm1103_vm1 = vcmp.gt.f32.partialorder %v1071_v57, 0.0 }
 0x273   :  { %1570 = vst [vmem:[%s2356_s5 + $0x38] sm:$0xff] %v1522_v6   ;;  %v1650_v4 = vpop.f32.mrf.mxu1 }
 0x274   :  { %v1072_v28 = vadd.f32 %v1040_v34, %v463_v29  ;;  %v1651_v5 = vadd.f32 %v1650_v4, %v1649_v3  ;;  %v1167_v7 = vsel %vm1103_vm1, %v1071_v57, %v1135_v56  ;;  %v981_v34 = vpop.permute.xlu1 %980 }
 0x275   :  { %v1652_v45 = vpop.f32.mrf.mxu1 }
 0x276   :  { %vm1104_vm2 = vcmp.gt.f32.partialorder %v1072_v28, 0.0  ;;  %v1136_v22 = vmul.f32 0.01, %v1072_v28  ;;  %v1041_v30 = vmul.f32 %v1651_v5, %v956_v8 }
 0x277   :  { %v1653_v32 = vpop.f32.mrf.mxu1 }
 0x278   :  { %v1168_v58 = vsel %vm1104_vm2, %v1072_v28, %v1136_v22  ;;  %v1073_v37 = vadd.f32 %v1041_v30, %v464_v10  ;;  %v1654_v40 = vadd.f32 %v1653_v32, %v1652_v45  ;;  %v469_v28 = vadd.f32 %v2237_v62, %v2003_v20  ;;  %v986_v22 = vpop.permute.xlu0 %985 }
 0x279   :  { %v1527_v49 = vpack.c.bf16 %v1168_v58, %v1167_v7  ;;  %v1655_v36 = vpop.f32.mrf.mxu1  ;;  %v470_v32 = vadd.f32 %v2237_v62, %v2013_v24 }
 0x27a   :  { %v1042_v52 = vmul.f32 %v1654_v40, %v961_v47  ;;  %v1137_v54 = vmul.f32 0.01, %v1073_v37  ;;  %vm1105_vm3 = vcmp.gt.f32.partialorder %v1073_v37, 0.0 }
 0x27b   :  { %1571 = vst [vmem:[%s2356_s5 + $0x40] sm:$0xff] %v1527_v49   ;;  %v1656_v9 = vpop.f32.mrf.mxu1 }
 0x27c   :  { %v1074_v1 = vadd.f32 %v1042_v52, %v465_v48  ;;  %v1657_v61 = vadd.f32 %v1656_v9, %v1655_v36  ;;  %v1169_v12 = vsel %vm1105_vm3, %v1073_v37, %v1137_v54  ;;  %v991_v36 = vpop.permute.xlu1 %990  ;;  %v471_v9 = vadd.f32 %v2237_v62, %v2015_v27 }
 0x27d   :  { %v1658_v44 = vpop.f32.mrf.mxu1 }
 0x27e   :  { %vm1106_vm4 = vcmp.gt.f32.partialorder %v1074_v1, 0.0  ;;  %v1138_v21 = vmul.f32 0.01, %v1074_v1  ;;  %v1043_v25 = vmul.f32 %v1657_v61, %v966_v35 }
 0x27f   :  { %v1659_v39 = vpop.f32.mrf.mxu1 }
 0x280   :  { %v1170_v51 = vsel %vm1106_vm4, %v1074_v1, %v1138_v21  ;;  %v1075_v55 = vadd.f32 %v1043_v25, %v466_v60  ;;  %v1660_v63 = vadd.f32 %v1659_v39, %v1658_v44  ;;  %v996_v44 = vpop.permute.xlu0 %995  ;;  %v472_v21 = vadd.f32 %v2237_v62, %v2029_v42 }
 0x281   :  { %v1532_v17 = vpack.c.bf16 %v1170_v51, %v1169_v12  ;;  %v1661_v19 = vpop.f32.mrf.mxu1 }
 0x282   :  { %v1044_v13 = vmul.f32 %v1660_v63, %v971_v26  ;;  %v1139_v43 = vmul.f32 0.01, %v1075_v55  ;;  %vm1107_vm5 = vcmp.gt.f32.partialorder %v1075_v55, 0.0  ;;  %v1001_v26 = vpop.permute.xlu1 %1000 }
 0x283   :  { %1572 = vst [vmem:[%s2356_s5 + $0x48] sm:$0xff] %v1532_v17   ;;  %v1662_v14 = vpop.f32.mrf.mxu1 }
 0x284   :  { %v1076_v31 = vadd.f32 %v1044_v13, %v467_v50  ;;  %v1663_v53 = vadd.f32 %v1662_v14, %v1661_v19  ;;  %v1171_v16 = vsel %vm1107_vm5, %v1075_v55, %v1139_v43  ;;  %v473_v50 = vadd.f32 %v2237_v62, %v2031_v46 }
 0x285   :  { %v1664_v2 = vpop.f32.mrf.mxu1 }
 0x286   :  { %vm1108_vm6 = vcmp.gt.f32.partialorder %v1076_v31, 0.0  ;;  %v1140_v57 = vmul.f32 0.01, %v1076_v31  ;;  %v1045_v33 = vmul.f32 %v1663_v53, %v976_v15  ;;  %v1006_v53 = vpop.permute.xlu0 %1005 }
 0x287   :  { %v1665_v41 = vpop.f32.mrf.mxu1 }
 0x288   :  { %v1172_v6 = vsel %vm1108_vm6, %v1076_v31, %v1140_v57  ;;  %v1077_v3 = vadd.f32 %v1045_v33, %v468_v38  ;;  %v1666_v29 = vadd.f32 %v1665_v41, %v1664_v2  ;;  %v474_v2 = vadd.f32 %v2237_v62, %v2045_v59 }
 0x289   :  { %v1537_v4 = vpack.c.bf16 %v1172_v6, %v1171_v16  ;;  %v1667_v56 = vpop.f32.mrf.mxu1 }
 0x28a   :  { %v1046_v5 = vmul.f32 %v1666_v29, %v981_v34  ;;  %v1141_v8 = vmul.f32 0.01, %v1077_v3  ;;  %vm1109_vm7 = vcmp.gt.f32.partialorder %v1077_v3, 0.0 }
 0x28b   :  { %1573 = vst [vmem:[%s2356_s5 + $0x50] sm:$0xff] %v1537_v4   ;;  %v1668_v18 = vpop.f32.mrf.mxu1  ;;  %v475_v4 = vadd.f32 %v2237_v62, %v2047_v0 }
 0x28c   :  { %v1078_v45 = vadd.f32 %v1046_v5, %v469_v28  ;;  %v1669_v10 = vadd.f32 %v1668_v18, %v1667_v56  ;;  %v1173_v20 = vsel %vm1109_vm7, %v1077_v3, %v1141_v8  ;;  %v1011_v3 = vpop.permute.xlu1 %1010  ;;  %v1016_v8 = vpop.permute.xlu0 %1015 }
 0x28d   :  { %v1670_v30 = vpop.f32.mrf.mxu1 }
 0x28e   :  { %vm1110_vm8 = vcmp.gt.f32.partialorder %v1078_v45, 0.0  ;;  %v1142_v7 = vmul.f32 0.01, %v1078_v45  ;;  %v1047_v58 = vmul.f32 %v1669_v10, %v986_v22  ;;  %v476_v10 = vadd.f32 %v2237_v62, %v2061_v23 }
 0x28f   :  { %v1671_v37 = vpop.f32.mrf.mxu1 }
 0x290   :  { %v1174_v40 = vsel %vm1110_vm8, %v1078_v45, %v1142_v7  ;;  %v1079_v47 = vadd.f32 %v1047_v58, %v470_v32  ;;  %v1672_v49 = vadd.f32 %v1671_v37, %v1670_v30 }
 0x291   :  { %v1542_v48 = vpack.c.bf16 %v1174_v40, %v1173_v20  ;;  %v1673_v52 = vpop.f32.mrf.mxu1  ;;  %v1021_v20 = vpop.permute.xlu1 %1020 }
 0x292   :  { %v1048_v54 = vmul.f32 %v1672_v49, %v991_v36  ;;  %v1143_v1 = vmul.f32 0.01, %v1079_v47  ;;  %vm1111_vm9 = vcmp.gt.f32.partialorder %v1079_v47, 0.0 }
 0x293   :  { %1574 = vst [vmem:[%s2356_s5 + $0x58] sm:$0xff] %v1542_v48   ;;  %v1674_v24 = vpop.f32.mrf.mxu1 }
 0x294   :  { %v1080_v61 = vadd.f32 %v1048_v54, %v471_v9  ;;  %v1675_v35 = vadd.f32 %v1674_v24, %v1673_v52  ;;  %v1175_v27 = vsel %vm1111_vm9, %v1079_v47, %v1143_v1  ;;  %v477_v47 = vadd.f32 %v2237_v62, %v2232_v11 }
 0x295   :  { %v1676_v60 = vpop.f32.mrf.mxu1 }
 0x296   :  { %vm1112_vm10 = vcmp.gt.f32.partialorder %v1080_v61, 0.0  ;;  %v1144_v25 = vmul.f32 0.01, %v1080_v61  ;;  %v1049_v39 = vmul.f32 %v1675_v35, %v996_v44 }
 0x297   :  { %v1677_v12 = vpop.f32.mrf.mxu1 }
 0x298   :  { %v1176_v51 = vsel %vm1112_vm10, %v1080_v61, %v1144_v25  ;;  %v1081_v55 = vadd.f32 %v1049_v39, %v472_v21  ;;  %v1678_v63 = vadd.f32 %v1677_v12, %v1676_v60 }
 0x299   :  { %v1547_v17 = vpack.c.bf16 %v1176_v51, %v1175_v27  ;;  %v1679_v19 = vpop.f32.mrf.mxu1 }
 0x29a   :  { %v1050_v13 = vmul.f32 %v1678_v63, %v1001_v26  ;;  %v1145_v14 = vmul.f32 0.01, %v1081_v55  ;;  %vm1113_vm11 = vcmp.gt.f32.partialorder %v1081_v55, 0.0 }
 0x29b   :  { %1575 = vst [vmem:[%s2356_s5 + $0x60] sm:$0xff] %v1547_v17   ;;  %v1680_v42 = vpop.f32.mrf.mxu1 }
 0x29c   :  { %v1082_v43 = vadd.f32 %v1050_v13, %v473_v50  ;;  %v1681_v31 = vadd.f32 %v1680_v42, %v1679_v19  ;;  %v1177_v46 = vsel %vm1113_vm11, %v1081_v55, %v1145_v14 }
 0x29d   :  { %v1682_v15 = vpop.f32.mrf.mxu1 }
 0x29e   :  { %vm1114_vm12 = vcmp.gt.f32.partialorder %v1082_v43, 0.0  ;;  %v1146_v38 = vmul.f32 0.01, %v1082_v43  ;;  %v1051_v57 = vmul.f32 %v1681_v31, %v1006_v53 }
 0x29f   :  { %v1683_v33 = vpop.f32.mrf.mxu1 }
 0x2a0   :  { %v1178_v41 = vsel %vm1114_vm12, %v1082_v43, %v1146_v38  ;;  %v1083_v16 = vadd.f32 %v1051_v57, %v474_v2  ;;  %v1684_v6 = vadd.f32 %v1683_v33, %v1682_v15 }
 0x2a1   :  { %v1552_v29 = vpack.c.bf16 %v1178_v41, %v1177_v46  ;;  %v1685_v34 = vpop.f32.mrf.mxu1 }
 0x2a2   :  { %v1052_v56 = vmul.f32 %v1684_v6, %v1011_v3  ;;  %v1147_v28 = vmul.f32 0.01, %v1083_v16  ;;  %vm1115_vm13 = vcmp.gt.f32.partialorder %v1083_v16, 0.0 }
 0x2a3   :  { %1576 = vst [vmem:[%s2356_s5 + $0x68] sm:$0xff] %v1552_v29   ;;  %v1686_v59 = vpop.f32.mrf.mxu1 }
 0x2a4   :  { %v1084_v5 = vadd.f32 %v1052_v56, %v475_v4  ;;  %v1687_v18 = vadd.f32 %v1686_v59, %v1685_v34  ;;  %v1179_v0 = vsel %vm1115_vm13, %v1083_v16, %v1147_v28 }
 0x2a5   :  { %v1688_v45 = vpop.f32.mrf.mxu1 }
 0x2a6   :  { %vm1116_vm14 = vcmp.gt.f32.partialorder %v1084_v5, 0.0  ;;  %v1148_v22 = vmul.f32 0.01, %v1084_v5  ;;  %v1053_v30 = vmul.f32 %v1687_v18, %v1016_v8 }
 0x2a7   :  { %v1689_v32 = vpop.f32.mrf.mxu1 }
 0x2a8   :  { %v1180_v7 = vsel %vm1116_vm14, %v1084_v5, %v1148_v22  ;;  %v1085_v58 = vadd.f32 %v1053_v30, %v476_v10  ;;  %v1690_v37 = vadd.f32 %v1689_v32, %v1688_v45 }
 0x2a9   :  { %v1557_v40 = vpack.c.bf16 %v1180_v7, %v1179_v0 }
 0x2aa   :  { %v1054_v49 = vmul.f32 %v1690_v37, %v1021_v20  ;;  %v1149_v36 = vmul.f32 0.01, %v1085_v58  ;;  %vm1117_vm15 = vcmp.gt.f32.partialorder %v1085_v58, 0.0 }
 0x2ab   :  { %1577 = vst [vmem:[%s2356_s5 + $0x70] sm:$0xff] %v1557_v40  }
 0x2ac   :  { %v1086_v23 = vadd.f32 %v1054_v49, %v477_v47  ;;  %v1181_v52 = vsel %vm1117_vm15, %v1085_v58, %v1149_v36 }
 0x2ae   :  { %vm1118_vm0 = vcmp.gt.f32.partialorder %v1086_v23, 0.0  ;;  %v1150_v48 = vmul.f32 0.01, %v1086_v23 }
 0x2b0   :  { %v1182_v9 = vsel %vm1118_vm0, %v1086_v23, %v1150_v48 }
 0x2b1   :  { %v1562_v54 = vpack.c.bf16 %v1182_v9, %v1181_v52 }
 0x2b3   :  { %1578 = vst [vmem:[%s2356_s5 + $0x78] sm:$0xff] %v1562_v54  }

</bundles_post_ra>
